<compile_context>
chip_gen: v5e
topology: v5e:2x2
jax: 0.10.0
libtpu: 0.0.40
codegen_flags: <defaults>
</compile_context>

<pallas_src>
import jax
import jax.numpy as jnp
from jax import lax
from jax.experimental import pallas as pl
from jax.experimental.pallas import tpu as pltpu

EPS = 1e-5
LANE = 128          # channel dims padded to a multiple of this (lane-dense I/O)
SUBLANE = 8
TM_TARGET = 512     # pixel-tile rows for the 1x1-conv / tail kernels
VMEM_LIMIT = 48 * 1024 * 1024   # > v5e/v6e scoped defaults, < v7x physical 64 MiB


# ----------------------------------------------------------------------------
# small helpers
# ----------------------------------------------------------------------------
def _round_up(x, m):
    return (x + m - 1) // m * m


def _pick_tile(m, target=TM_TARGET):
    """m is pre-padded (multiple of SUBLANE, and of target when m > target)."""
    return m if m <= target else target


def _pad_pixels(m):
    if m <= TM_TARGET:
        return _round_up(m, SUBLANE)
    return _round_up(m, TM_TARGET)


def _pad2(w, rows, cols):
    r, c = w.shape
    return jnp.pad(w, ((0, rows - r), (0, cols - c)))


def _pad_rows(a, rows):
    return jnp.pad(a, ((0, rows - a.shape[0]), (0, 0)))


def fold_bn(bn, c_pad):
    """Fold eval-mode BatchNorm into per-channel (scale, shift), lane-padded."""
    gamma, beta, mean, var = bn
    inv = gamma / jnp.sqrt(var + EPS)
    scale = jnp.pad(inv, (0, c_pad - inv.shape[0]))
    shift = jnp.pad(beta - mean * inv, (0, c_pad - inv.shape[0]))
    return (scale.astype(jnp.float32).reshape(1, c_pad),
            shift.astype(jnp.float32).reshape(1, c_pad))


# ----------------------------------------------------------------------------
# Single-buffering of grid-constant operands (capability probed once).
# ----------------------------------------------------------------------------
def _probe_buffered_single():
    if not hasattr(pl, "Buffered"):
        return False
    try:
        def k(a_ref, w_ref, o_ref):
            o_ref[...] = a_ref[...] + w_ref[...]

        w_spec = pl.BlockSpec((SUBLANE, LANE), lambda i: (0, 0),
                              pipeline_mode=pl.Buffered(1))
        out = pl.pallas_call(
            k,
            out_shape=jax.ShapeDtypeStruct((2 * SUBLANE, LANE), jnp.float32),
            grid_spec=pltpu.PrefetchScalarGridSpec(
                num_scalar_prefetch=0,
                grid=(2,),
                in_specs=[pl.BlockSpec((SUBLANE, LANE), lambda i: (i, 0)),
                          w_spec],
                out_specs=pl.BlockSpec((SUBLANE, LANE), lambda i: (i, 0))),
        )(jnp.ones((2 * SUBLANE, LANE), jnp.float32),
          jnp.ones((SUBLANE, LANE), jnp.float32))
        jax.block_until_ready(out)
        return True
    except Exception:          # fall back to default double-buffering
        return False


_BUFFERED_OK = _probe_buffered_single()


def _resident_spec(block_shape, index_map):
    """BlockSpec for an operand whose index_map ignores the grid indices
    (weights, BN scale/shift): single-buffered when supported so VMEM does not
    pay 2x for data that never changes."""
    if _BUFFERED_OK:
        return pl.BlockSpec(block_shape, index_map, pipeline_mode=pl.Buffered(1))
    return pl.BlockSpec(block_shape, index_map)


# ----------------------------------------------------------------------------
# Kernel 1: 1x1 conv + folded BN [+ residual] [+ ReLU], gridded over M tiles.
# Weights/BN affine are VMEM-resident (single DMA); no K re-streaming.
# ----------------------------------------------------------------------------
def _make_conv1x1_kernel(relu, has_res):
    def kernel(*refs):
        if has_res:
            x_ref, w_ref, s_ref, b_ref, res_ref, o_ref = refs
        else:
            x_ref, w_ref, s_ref, b_ref, o_ref = refs
            res_ref = None
        y = jnp.dot(x_ref[...], w_ref[...], preferred_element_type=jnp.float32)
        y = y * s_ref[...] + b_ref[...]
        if has_res:
            y = y + res_ref[...].astype(jnp.float32)
        if relu:
            y = jnp.maximum(y, 0.0)
        o_ref[...] = y.astype(o_ref.dtype)

    return kernel


def conv1x1_bn(x, w, scale, shift, residual=None, relu=True,
               out_dtype=jnp.bfloat16):
    """act((x @ w) * scale + shift [+ residual]); x:(M,K) bf16, w:(K,Cout) bf16."""
    M, K = x.shape
    Cout = w.shape[1]
    tm = _pick_tile(M)
    in_specs = [
        pl.BlockSpec((tm, K), lambda i: (i, 0)),          # activation tile
        _resident_spec((K, Cout), lambda i: (0, 0)),      # weight (resident)
        _resident_spec((1, Cout), lambda i: (0, 0)),      # BN scale (resident)
        _resident_spec((1, Cout), lambda i: (0, 0)),      # BN shift (resident)
    ]
    args = [x, w, scale, shift]
    if residual is not None:
        in_specs.append(pl.BlockSpec((tm, Cout), lambda i: (i, 0)))
        args.append(residual)

    return pl.pallas_call(
        _make_conv1x1_kernel(relu, residual is not None),
        out_shape=jax.ShapeDtypeStruct((M, Cout), out_dtype),
        grid_spec=pltpu.PrefetchScalarGridSpec(
            num_scalar_prefetch=0,
            grid=(M // tm,),
            in_specs=in_specs,
            out_specs=pl.BlockSpec((tm, Cout), lambda i: (i, 0))),
        compiler_params=pltpu.CompilerParams(
            dimension_semantics=("parallel",),
            vmem_limit_bytes=VMEM_LIMIT),
    )(*args)


# ----------------------------------------------------------------------------
# Kernel 2: 3x3 conv (pad=1) + folded BN + ReLU.
# The halo-padded image arrives flattened; the 9 taps are contiguous pl.ds
# views (sublane-shifted loads, no windowing relayout), accumulated in an f32
# VMEM scratch.  Output rows include 2 junk columns per image row (sliced off
# by the caller), keeping every tap view and the store fully lane-dense.
# ----------------------------------------------------------------------------
def _make_conv3x3_kernel(H, W):
    Wp = W + 2
    L = H * Wp          # rows computed per image (incl. 2 junk cols per row)

    def kernel(xf_ref, w_ref, s_ref, b_ref, o_ref, acc_ref):
        for t in range(9):
            dy, dx = divmod(t, 3)
            win = xf_ref[pl.ds(dy * Wp + dx, L), :]       # contiguous bf16 view
            p = jnp.dot(win, w_ref[t], preferred_element_type=jnp.float32)
            if t == 0:
                acc_ref[...] = p
            else:
                acc_ref[...] += p
        y = acc_ref[...] * s_ref[...] + b_ref[...]
        o_ref[...] = jnp.maximum(y, 0.0).astype(o_ref.dtype)

    return kernel


def conv3x3_bn_relu(xflat, w_taps, scale, shift, H, W, out_dtype=jnp.bfloat16):
    """xflat: (N, P, C) bf16 flattened halo-padded image, P >= (H+2)*(W+2)+2.
    Returns (N, H*(W+2), Cout); columns W..W+1 of each row are junk."""
    N, P, C = xflat.shape
    Cout = w_taps.shape[-1]
    L = H * (W + 2)
    # TODO(synk): for very large images, tile the pixel dim with overlapping
    # row blocks instead of one grid step per image.
    return pl.pallas_call(
        _make_conv3x3_kernel(H, W),
        out_shape=jax.ShapeDtypeStruct((N, L, Cout), out_dtype),
        grid_spec=pltpu.PrefetchScalarGridSpec(
            num_scalar_prefetch=0,
            grid=(N,),
            in_specs=[
                pl.BlockSpec((None, P, C), lambda n: (n, 0, 0)),
                _resident_spec((9, C, Cout), lambda n: (0, 0, 0)),
                _resident_spec((1, Cout), lambda n: (0, 0)),
                _resident_spec((1, Cout), lambda n: (0, 0)),
            ],
            out_specs=pl.BlockSpec((None, L, Cout), lambda n: (n, 0, 0)),
            scratch_shapes=[pltpu.VMEM((L, Cout), jnp.float32)]),
        compiler_params=pltpu.CompilerParams(
            dimension_semantics=("parallel",),
            vmem_limit_bytes=VMEM_LIMIT),
    )(xflat, w_taps, scale, shift)


# ----------------------------------------------------------------------------
# Kernel 3: fused tail — conv3+bn3 and downsample-conv+bnd, add, ReLU (bf16 out)
# ----------------------------------------------------------------------------
def _tail_down_kernel(y_ref, w3_ref, s3_ref, b3_ref,
                      x_ref, wd_ref, sd_ref, bd_ref, o_ref):
    main = jnp.dot(y_ref[...], w3_ref[...], preferred_element_type=jnp.float32)
    main = main * s3_ref[...] + b3_ref[...]
    iden = jnp.dot(x_ref[...], wd_ref[...], preferred_element_type=jnp.float32)
    iden = iden * sd_ref[...] + bd_ref[...]
    o_ref[...] = jnp.maximum(main + iden, 0.0).astype(o_ref.dtype)


def tail_conv3_downsample(y, w3, s3, b3, x, wd, sd, bd, out_dtype=jnp.bfloat16):
    """relu( bn3(y @ w3) + bnd(x @ wd) ) in one pallas_call, gridded over M."""
    Mo, C1 = y.shape
    Cin = x.shape[1]
    Cout = w3.shape[1]
    tm = _pick_tile(Mo)
    return pl.pallas_call(
        _tail_down_kernel,
        out_shape=jax.ShapeDtypeStruct((Mo, Cout), out_dtype),
        grid_spec=pltpu.PrefetchScalarGridSpec(
            num_scalar_prefetch=0,
            grid=(Mo // tm,),
            in_specs=[
                pl.BlockSpec((tm, C1), lambda i: (i, 0)),
                _resident_spec((C1, Cout), lambda i: (0, 0)),
                _resident_spec((1, Cout), lambda i: (0, 0)),
                _resident_spec((1, Cout), lambda i: (0, 0)),
                pl.BlockSpec((tm, Cin), lambda i: (i, 0)),
                _resident_spec((Cin, Cout), lambda i: (0, 0)),
                _resident_spec((1, Cout), lambda i: (0, 0)),
                _resident_spec((1, Cout), lambda i: (0, 0)),
            ],
            out_specs=pl.BlockSpec((tm, Cout), lambda i: (i, 0))),
        compiler_params=pltpu.CompilerParams(
            dimension_semantics=("parallel",),
            vmem_limit_bytes=VMEM_LIMIT),
    )(y, w3, s3, b3, x, wd, sd, bd)


# ----------------------------------------------------------------------------
# JAX glue: pooling, layout, parameter init, full Bottleneck forward
# ----------------------------------------------------------------------------
def _sumpool_nhwc_bf16(x, s):
    """Sum-pool over s x s windows; 1/(s*s) is folded into the BN scale."""
    if s == 1:
        return x.astype(jnp.bfloat16)
    n, h, w, c = x.shape
    xr = x.reshape(n, h // s, s, w // s, s, c)
    return jnp.sum(xr, axis=(2, 4), dtype=jnp.float32).astype(jnp.bfloat16)


def bottleneck_pallas(x_nchw, p, stride):
    N, Cin, H, W = x_nchw.shape
    planes = p['w1'].shape[0]
    Cout = planes * 4
    assert H % stride == 0 and W % stride == 0, "H/W must be divisible by stride"
    Ho, Wo = H // stride, W // stride
    has_down = (stride > 1) or (Cin != Cout)

    Cin_p = _round_up(Cin, LANE)
    C1_p = _round_up(planes, LANE)
    Cout_p = _round_up(Cout, LANE)

    # NCHW -> NHWC, zero-pad channels to a lane multiple, cast to bf16 once.
    x_bf = jnp.pad(jnp.transpose(x_nchw, (0, 2, 3, 1)),
                   ((0, 0), (0, 0), (0, 0), (0, Cin_p - Cin))).astype(jnp.bfloat16)

    # ---- conv1 (1x1) + bn1 + relu -------------------------------------------
    M = N * H * W
    M_p = _pad_pixels(M)
    x_flat = _pad_rows(x_bf.reshape(M, Cin_p), M_p)
    w1 = _pad2(p['w1'][:, :, 0, 0].T, Cin_p, C1_p).astype(jnp.bfloat16)
    s1, b1 = fold_bn(p['bn1'], C1_p)
    y1 = conv1x1_bn(x_flat, w1, s1, b1, relu=True)            # (M_p, C1_p) bf16
    y1 = y1[:M].reshape(N, H, W, C1_p)

    # ---- conv2 (3x3, pad=1) + bn2 + relu -------------------------------------
    # TODO(synk): the halo pad below is one extra HBM round-trip of y1; it could
    # be removed by building the halo in-VMEM inside the conv2 kernel.
    Wp = W + 2
    P = (H + 2) * Wp
    P_pad = _round_up(P + 2, SUBLANE)   # +2: slack for the (dy=2,dx=2) tap view
    y1p = jnp.pad(y1, ((0, 0), (1, 1), (1, 1), (0, 0)))        # bf16 halo pad
    y1f = jnp.pad(y1p.reshape(N, P, C1_p), ((0, 0), (0, P_pad - P), (0, 0)))
    w2 = jnp.transpose(p['w2'], (2, 3, 1, 0)).reshape(9, planes, planes)
    w2 = jnp.pad(w2, ((0, 0), (0, C1_p - planes), (0, C1_p - planes)))
    s2, b2 = fold_bn(p['bn2'], C1_p)
    y2 = conv3x3_bn_relu(y1f, w2.astype(jnp.bfloat16), s2, b2, H, W)
    y2 = y2.reshape(N, H, Wp, C1_p)[:, :, :W, :]               # drop junk cols

    # ---- avgpool(stride): bf16 sum-pool, 1/(s*s) folded into BN scales -------
    y2p = _sumpool_nhwc_bf16(y2, stride)                       # (N, Ho, Wo, C1_p)

    # ---- fused tail: conv3+bn3 [+ downsample conv+bnd] + residual + relu -----
    Mo = N * Ho * Wo
    Mo_p = _pad_pixels(Mo)
    y2f = _pad_rows(y2p.reshape(Mo, C1_p), Mo_p)
    w3 = _pad2(p['w3'][:, :, 0, 0].T, C1_p, Cout_p).astype(jnp.bfloat16)
    s3, b3 = fold_bn(p['bn3'], Cout_p)
    pool_scale = 1.0 / float(stride * stride)
    if stride > 1:
        s3 = s3 * pool_scale

    if has_down:
        xpool = _sumpool_nhwc_bf16(x_bf, stride)               # (N, Ho, Wo, Cin_p)
        xf = _pad_rows(xpool.reshape(Mo, Cin_p), Mo_p)
        wd = _pad2(p['wd'][:, :, 0, 0].T, Cin_p, Cout_p).astype(jnp.bfloat16)
        sd, bd = fold_bn(p['bnd'], Cout_p)
        if stride > 1:
            sd = sd * pool_scale
        out = tail_conv3_downsample(y2f, w3, s3, b3, xf, wd, sd, bd)
    else:
        # pure identity residual (Cin == Cout): added in f32 in-register
        ident = _pad_rows(x_bf.reshape(Mo, Cin_p), Mo_p)
        out = conv1x1_bn(y2f, w3, s3, b3, residual=ident, relu=True)

    out = out[:Mo].reshape(N, Ho, Wo, Cout_p)[..., :Cout]
    # bf16 kernel outputs -> f32 module output; cast fuses with the transpose.
    return jnp.transpose(out, (0, 3, 1, 2)).astype(jnp.float32)


def init_params(key, inplanes, planes):
    exp = 4
    keys = jax.random.split(key, 8)

    def bn_params(k, c):
        k1, k2, k3, k4 = jax.random.split(k, 4)
        gamma = 1.0 + 0.1 * jax.random.normal(k1, (c,), jnp.float32)
        beta = 0.1 * jax.random.normal(k2, (c,), jnp.float32)
        mean = 0.1 * jax.random.normal(k3, (c,), jnp.float32)
        var = jnp.abs(jax.random.normal(k4, (c,), jnp.float32)) + 0.5
        return gamma, beta, mean, var

    p = {}
    p['w1'] = 0.1 * jax.random.normal(keys[0], (planes, inplanes, 1, 1), jnp.float32)
    p['bn1'] = bn_params(keys[1], planes)
    p['w2'] = 0.1 * jax.random.normal(keys[2], (planes, planes, 3, 3), jnp.float32)
    p['bn2'] = bn_params(keys[3], planes)
    p['w3'] = 0.1 * jax.random.normal(keys[4], (planes * exp, planes, 1, 1), jnp.float32)
    p['bn3'] = bn_params(keys[5], planes * exp)
    p['wd'] = 0.1 * jax.random.normal(keys[6], (planes * exp, inplanes, 1, 1), jnp.float32)
    p['bnd'] = bn_params(keys[7], planes * exp)
    return p


# ----------------------------------------------------------------------------
# Pure-JAX reference (mirrors the PyTorch forward, BN in eval mode)
# ----------------------------------------------------------------------------
def bottleneck_ref(x, p, stride):
    def bn(y, bnp):
        gamma, beta, mean, var = bnp
        inv = gamma / jnp.sqrt(var + EPS)
        return y * inv[None, :, None, None] + (beta - mean * inv)[None, :, None, None]

    def conv(y, w):
        pad = w.shape[2] // 2
        return lax.conv_general_dilated(
            y, w, window_strides=(1, 1), padding=((pad, pad), (pad, pad)),
            dimension_numbers=('NCHW', 'OIHW', 'NCHW'),
            precision=lax.Precision.HIGHEST)

    def avgpool(y, s):
        if s == 1:
            return y
        return lax.reduce_window(y, 0.0, lax.add, (1, 1, s, s), (1, 1, s, s),
                                 'VALID') / (s * s)

    cin = x.shape[1]
    planes = p['w1'].shape[0]
    cout = planes * 4
    out = jax.nn.relu(bn(conv(x, p['w1']), p['bn1']))
    out = jax.nn.relu(bn(conv(out, p['w2']), p['bn2']))
    out = avgpool(out, stride)
    out = bn(conv(out, p['w3']), p['bn3'])
    if stride > 1 or cin != cout:
        identity = bn(conv(avgpool(x, stride), p['wd']), p['bnd'])
    else:
        identity = x
    return jax.nn.relu(out + identity)


# ----------------------------------------------------------------------------
if __name__ == "__main__":
    fwd = jax.jit(bottleneck_pallas, static_argnums=2)

    configs = [
        # (inplanes, planes, stride, N, H, W)
        (16, 8, 2, 2, 8, 8),   # stride-2 block: avgpool + downsample branch
        (32, 8, 1, 2, 8, 8),   # stride-1, Cin == 4*planes: identity residual
    ]
    key = jax.random.PRNGKey(0)
    for inplanes, planes, stride, N, H, W in configs:
        key, kx, kp = jax.random.split(key, 3)
        x = jax.random.normal(kx, (N, inplanes, H, W), jnp.float32)
        params = init_params(kp, inplanes, planes)

        out = jax.block_until_ready(fwd(x, params, stride))
        ref = jax.block_until_ready(bottleneck_ref(x, params, stride))

        assert out.shape == ref.shape == (N, planes * 4, H // stride, W // stride)
        err = float(jnp.max(jnp.abs(out - ref)))
        # bf16 matmul operands + bf16 intermediates (f32 accumulation)
        assert jnp.allclose(out, ref, atol=3e-2, rtol=3e-2), f"max abs err = {err}"

    print("KERNEL_OK")
</pallas_src>

<mosaic_0001>
module attributes {stable_mosaic.version = 11 : i64} {
  func.func @k(%arg0: i32, %arg1: memref<8x128xf32, #tpu.memory_space<vmem>>, %arg2: memref<8x128xf32, #tpu.memory_space<vmem>>, %arg3: memref<8x128xf32, #tpu.memory_space<vmem>>) attributes {dimension_semantics = [#tpu.dimension_semantics<arbitrary>], iteration_bounds = array<i64: 2>, scalar_prefetch = 0 : i64, scratch_operands = 0 : i64, tpu.core_type = #tpu.core_type<tc>, window_params = [{transform_indices = @transform_0, window_bounds = array<i64: 8, 128>}, {pipeline_mode = #tpu.pipeline_mode<synchronous>, transform_indices = @transform_1, window_bounds = array<i64: 8, 128>}, {transform_indices = @transform_2, window_bounds = array<i64: 8, 128>}]} {
    %c0 = arith.constant 0 : index
    %c0_0 = arith.constant 0 : index
    %0 = vector.load %arg1[%c0, %c0_0] : memref<8x128xf32, #tpu.memory_space<vmem>>, vector<8x128xf32>
    %c0_1 = arith.constant 0 : index
    %c0_2 = arith.constant 0 : index
    %1 = vector.load %arg2[%c0_1, %c0_2] : memref<8x128xf32, #tpu.memory_space<vmem>>, vector<8x128xf32>
    %2 = arith.addf %0, %1 : vector<8x128xf32>
    %c0_3 = arith.constant 0 : index
    %c0_4 = arith.constant 0 : index
    %3 = vector.load %arg3[%c0_3, %c0_4] : memref<8x128xf32, #tpu.memory_space<vmem>>, vector<8x128xf32>
    tpu.vector_store %arg3[%c0_3, %c0_4], %2 {strides = array<i32>} : memref<8x128xf32, #tpu.memory_space<vmem>>, vector<8x128xf32>,
    return
  }
  func.func @transform_0(%arg0: i32) -> (i32, i32) {
    %c0_i32 = arith.constant 0 : i32
    %c0_i32_0 = arith.constant 0 : i32
    return %arg0, %c0_i32 : i32, i32
  }
  func.func @transform_1(%arg0: i32) -> (i32, i32) {
    %c0_i32 = arith.constant 0 : i32
    %c0_i32_0 = arith.constant 0 : i32
    %c0_i32_1 = arith.constant 0 : i32
    return %c0_i32, %c0_i32_0 : i32, i32
  }
  func.func @transform_2(%arg0: i32) -> (i32, i32) {
    %c0_i32 = arith.constant 0 : i32
    %c0_i32_0 = arith.constant 0 : i32
    return %arg0, %c0_i32 : i32, i32
  }
}

module attributes {stable_mosaic.version = 11 : i64} {
  func.func @kernel(%arg0: i32, %arg1: memref<1x104x128xbf16, #tpu.memory_space<vmem>>, %arg2: memref<9x128x128xbf16, #tpu.memory_space<vmem>>, %arg3: memref<1x128xf32, #tpu.memory_space<vmem>>, %arg4: memref<1x128xf32, #tpu.memory_space<vmem>>, %arg5: memref<1x80x128xbf16, #tpu.memory_space<vmem>>, %arg6: memref<80x128xf32, #tpu.memory_space<vmem>>) attributes {dimension_semantics = [#tpu.dimension_semantics<parallel>], iteration_bounds = array<i64: 2>, scalar_prefetch = 0 : i64, scratch_operands = 1 : i64, tpu.core_type = #tpu.core_type<tc>, window_params = [{transform_indices = @transform_0, window_bounds = array<i64: 1, 104, 128>}, {pipeline_mode = #tpu.pipeline_mode<synchronous>, transform_indices = @transform_1, window_bounds = array<i64: 9, 128, 128>}, {pipeline_mode = #tpu.pipeline_mode<synchronous>, transform_indices = @transform_2, window_bounds = array<i64: 1, 128>}, {pipeline_mode = #tpu.pipeline_mode<synchronous>, transform_indices = @transform_3, window_bounds = array<i64: 1, 128>}, {transform_indices = @transform_4, window_bounds = array<i64: 1, 80, 128>}]} {
    %c0 = arith.constant 0 : index
    %c0_0 = arith.constant 0 : index
    %c0_1 = arith.constant 0 : index
    %0 = vector.load %arg1[%c0, %c0_0, %c0_1] : memref<1x104x128xbf16, #tpu.memory_space<vmem>>, vector<1x80x128xbf16>
    %1 = vector.shape_cast %0 : vector<1x80x128xbf16> to vector<80x128xbf16>
    %c0_2 = arith.constant 0 : index
    %c0_3 = arith.constant 0 : index
    %c0_4 = arith.constant 0 : index
    %2 = vector.load %arg2[%c0_2, %c0_3, %c0_4] : memref<9x128x128xbf16, #tpu.memory_space<vmem>>, vector<1x128x128xbf16>
    %3 = vector.shape_cast %2 : vector<1x128x128xbf16> to vector<128x128xbf16>
    %cst = arith.constant dense<0.000000e+00> : vector<80x128xf32>
    %4 = tpu.matmul %1, %3, %cst {dimension_numbers = #tpu.dot_dimension_numbers<[1], [0], [0], [1], [0, 0, 1, 1], [], []>} : vector<80x128xbf16>, vector<128x128xbf16>, vector<80x128xf32> -> vector<80x128xf32>
    %c0_5 = arith.constant 0 : index
    %c0_6 = arith.constant 0 : index
    %5 = vector.load %arg6[%c0_5, %c0_6] : memref<80x128xf32, #tpu.memory_space<vmem>>, vector<80x128xf32>
    tpu.vector_store %arg6[%c0_5, %c0_6], %4 {strides = array<i32>} : memref<80x128xf32, #tpu.memory_space<vmem>>, vector<80x128xf32>,
    %c0_7 = arith.constant 0 : index
    %c1 = arith.constant 1 : index
    %c0_8 = arith.constant 0 : index
    %6 = vector.load %arg1[%c0_7, %c1, %c0_8] : memref<1x104x128xbf16, #tpu.memory_space<vmem>>, vector<1x80x128xbf16>
    %7 = vector.shape_cast %6 : vector<1x80x128xbf16> to vector<80x128xbf16>
    %c1_9 = arith.constant 1 : index
    %c0_10 = arith.constant 0 : index
    %c0_11 = arith.constant 0 : index
    %8 = vector.load %arg2[%c1_9, %c0_10, %c0_11] : memref<9x128x128xbf16, #tpu.memory_space<vmem>>, vector<1x128x128xbf16>
    %9 = vector.shape_cast %8 : vector<1x128x128xbf16> to vector<128x128xbf16>
    %cst_12 = arith.constant dense<0.000000e+00> : vector<80x128xf32>
    %10 = tpu.matmul %7, %9, %cst_12 {dimension_numbers = #tpu.dot_dimension_numbers<[1], [0], [0], [1], [0, 0, 1, 1], [], []>} : vector<80x128xbf16>, vector<128x128xbf16>, vector<80x128xf32> -> vector<80x128xf32>
    %c0_13 = arith.constant 0 : index
    %c0_14 = arith.constant 0 : index
    %11 = vector.load %arg6[%c0_13, %c0_14] : memref<80x128xf32, #tpu.memory_space<vmem>>, vector<80x128xf32>
    %12 = arith.addf %11, %10 : vector<80x128xf32>
    %c0_15 = arith.constant 0 : index
    %c0_16 = arith.constant 0 : index
    %13 = vector.load %arg6[%c0_15, %c0_16] : memref<80x128xf32, #tpu.memory_space<vmem>>, vector<80x128xf32>
    tpu.vector_store %arg6[%c0_15, %c0_16], %12 {strides = array<i32>} : memref<80x128xf32, #tpu.memory_space<vmem>>, vector<80x128xf32>,
    %c0_17 = arith.constant 0 : index
    %c2 = arith.constant 2 : index
    %c0_18 = arith.constant 0 : index
    %14 = vector.load %arg1[%c0_17, %c2, %c0_18] : memref<1x104x128xbf16, #tpu.memory_space<vmem>>, vector<1x80x128xbf16>
    %15 = vector.shape_cast %14 : vector<1x80x128xbf16> to vector<80x128xbf16>
    %c2_19 = arith.constant 2 : index
    %c0_20 = arith.constant 0 : index
    %c0_21 = arith.constant 0 : index
    %16 = vector.load %arg2[%c2_19, %c0_20, %c0_21] : memref<9x128x128xbf16, #tpu.memory_space<vmem>>, vector<1x128x128xbf16>
    %17 = vector.shape_cast %16 : vector<1x128x128xbf16> to vector<128x128xbf16>
    %cst_22 = arith.constant dense<0.000000e+00> : vector<80x128xf32>
    %18 = tpu.matmul %15, %17, %cst_22 {dimension_numbers = #tpu.dot_dimension_numbers<[1], [0], [0], [1], [0, 0, 1, 1], [], []>} : vector<80x128xbf16>, vector<128x128xbf16>, vector<80x128xf32> -> vector<80x128xf32>
    %c0_23 = arith.constant 0 : index
    %c0_24 = arith.constant 0 : index
    %19 = vector.load %arg6[%c0_23, %c0_24] : memref<80x128xf32, #tpu.memory_space<vmem>>, vector<80x128xf32>
    %20 = arith.addf %19, %18 : vector<80x128xf32>
    %c0_25 = arith.constant 0 : index
    %c0_26 = arith.constant 0 : index
    %21 = vector.load %arg6[%c0_25, %c0_26] : memref<80x128xf32, #tpu.memory_space<vmem>>, vector<80x128xf32>
    tpu.vector_store %arg6[%c0_25, %c0_26], %20 {strides = array<i32>} : memref<80x128xf32, #tpu.memory_space<vmem>>, vector<80x128xf32>,
    %c0_27 = arith.constant 0 : index
    %c10 = arith.constant 10 : index
    %c0_28 = arith.constant 0 : index
    %22 = vector.load %arg1[%c0_27, %c10, %c0_28] : memref<1x104x128xbf16, #tpu.memory_space<vmem>>, vector<1x80x128xbf16>
    %23 = vector.shape_cast %22 : vector<1x80x128xbf16> to vector<80x128xbf16>
    %c3 = arith.constant 3 : index
    %c0_29 = arith.constant 0 : index
    %c0_30 = arith.constant 0 : index
    %24 = vector.load %arg2[%c3, %c0_29, %c0_30] : memref<9x128x128xbf16, #tpu.memory_space<vmem>>, vector<1x128x128xbf16>
    %25 = vector.shape_cast %24 : vector<1x128x128xbf16> to vector<128x128xbf16>
    %cst_31 = arith.constant dense<0.000000e+00> : vector<80x128xf32>
    %26 = tpu.matmul %23, %25, %cst_31 {dimension_numbers = #tpu.dot_dimension_numbers<[1], [0], [0], [1], [0, 0, 1, 1], [], []>} : vector<80x128xbf16>, vector<128x128xbf16>, vector<80x128xf32> -> vector<80x128xf32>
    %c0_32 = arith.constant 0 : index
    %c0_33 = arith.constant 0 : index
    %27 = vector.load %arg6[%c0_32, %c0_33] : memref<80x128xf32, #tpu.memory_space<vmem>>, vector<80x128xf32>
    %28 = arith.addf %27, %26 : vector<80x128xf32>
    %c0_34 = arith.constant 0 : index
    %c0_35 = arith.constant 0 : index
    %29 = vector.load %arg6[%c0_34, %c0_35] : memref<80x128xf32, #tpu.memory_space<vmem>>, vector<80x128xf32>
    tpu.vector_store %arg6[%c0_34, %c0_35], %28 {strides = array<i32>} : memref<80x128xf32, #tpu.memory_space<vmem>>, vector<80x128xf32>,
    %c0_36 = arith.constant 0 : index
    %c11 = arith.constant 11 : index
    %c0_37 = arith.constant 0 : index
    %30 = vector.load %arg1[%c0_36, %c11, %c0_37] : memref<1x104x128xbf16, #tpu.memory_space<vmem>>, vector<1x80x128xbf16>
    %31 = vector.shape_cast %30 : vector<1x80x128xbf16> to vector<80x128xbf16>
    %c4 = arith.constant 4 : index
    %c0_38 = arith.constant 0 : index
    %c0_39 = arith.constant 0 : index
    %32 = vector.load %arg2[%c4, %c0_38, %c0_39] : memref<9x128x128xbf16, #tpu.memory_space<vmem>>, vector<1x128x128xbf16>
    %33 = vector.shape_cast %32 : vector<1x128x128xbf16> to vector<128x128xbf16>
    %cst_40 = arith.constant dense<0.000000e+00> : vector<80x128xf32>
    %34 = tpu.matmul %31, %33, %cst_40 {dimension_numbers = #tpu.dot_dimension_numbers<[1], [0], [0], [1], [0, 0, 1, 1], [], []>} : vector<80x128xbf16>, vector<128x128xbf16>, vector<80x128xf32> -> vector<80x128xf32>
    %c0_41 = arith.constant 0 : index
    %c0_42 = arith.constant 0 : index
    %35 = vector.load %arg6[%c0_41, %c0_42] : memref<80x128xf32, #tpu.memory_space<vmem>>, vector<80x128xf32>
    %36 = arith.addf %35, %34 : vector<80x128xf32>
    %c0_43 = arith.constant 0 : index
    %c0_44 = arith.constant 0 : index
    %37 = vector.load %arg6[%c0_43, %c0_44] : memref<80x128xf32, #tpu.memory_space<vmem>>, vector<80x128xf32>
    tpu.vector_store %arg6[%c0_43, %c0_44], %36 {strides = array<i32>} : memref<80x128xf32, #tpu.memory_space<vmem>>, vector<80x128xf32>,
    %c0_45 = arith.constant 0 : index
    %c12 = arith.constant 12 : index
    %c0_46 = arith.constant 0 : index
    %38 = vector.load %arg1[%c0_45, %c12, %c0_46] : memref<1x104x128xbf16, #tpu.memory_space<vmem>>, vector<1x80x128xbf16>
    %39 = vector.shape_cast %38 : vector<1x80x128xbf16> to vector<80x128xbf16>
    %c5 = arith.constant 5 : index
    %c0_47 = arith.constant 0 : index
    %c0_48 = arith.constant 0 : index
    %40 = vector.load %arg2[%c5, %c0_47, %c0_48] : memref<9x128x128xbf16, #tpu.memory_space<vmem>>, vector<1x128x128xbf16>
    %41 = vector.shape_cast %40 : vector<1x128x128xbf16> to vector<128x128xbf16>
    %cst_49 = arith.constant dense<0.000000e+00> : vector<80x128xf32>
    %42 = tpu.matmul %39, %41, %cst_49 {dimension_numbers = #tpu.dot_dimension_numbers<[1], [0], [0], [1], [0, 0, 1, 1], [], []>} : vector<80x128xbf16>, vector<128x128xbf16>, vector<80x128xf32> -> vector<80x128xf32>
    %c0_50 = arith.constant 0 : index
    %c0_51 = arith.constant 0 : index
    %43 = vector.load %arg6[%c0_50, %c0_51] : memref<80x128xf32, #tpu.memory_space<vmem>>, vector<80x128xf32>
    %44 = arith.addf %43, %42 : vector<80x128xf32>
    %c0_52 = arith.constant 0 : index
    %c0_53 = arith.constant 0 : index
    %45 = vector.load %arg6[%c0_52, %c0_53] : memref<80x128xf32, #tpu.memory_space<vmem>>, vector<80x128xf32>
    tpu.vector_store %arg6[%c0_52, %c0_53], %44 {strides = array<i32>} : memref<80x128xf32, #tpu.memory_space<vmem>>, vector<80x128xf32>,
    %c0_54 = arith.constant 0 : index
    %c20 = arith.constant 20 : index
    %c0_55 = arith.constant 0 : index
    %46 = vector.load %arg1[%c0_54, %c20, %c0_55] : memref<1x104x128xbf16, #tpu.memory_space<vmem>>, vector<1x80x128xbf16>
    %47 = vector.shape_cast %46 : vector<1x80x128xbf16> to vector<80x128xbf16>
    %c6 = arith.constant 6 : index
    %c0_56 = arith.constant 0 : index
    %c0_57 = arith.constant 0 : index
    %48 = vector.load %arg2[%c6, %c0_56, %c0_57] : memref<9x128x128xbf16, #tpu.memory_space<vmem>>, vector<1x128x128xbf16>
    %49 = vector.shape_cast %48 : vector<1x128x128xbf16> to vector<128x128xbf16>
    %cst_58 = arith.constant dense<0.000000e+00> : vector<80x128xf32>
    %50 = tpu.matmul %47, %49, %cst_58 {dimension_numbers = #tpu.dot_dimension_numbers<[1], [0], [0], [1], [0, 0, 1, 1], [], []>} : vector<80x128xbf16>, vector<128x128xbf16>, vector<80x128xf32> -> vector<80x128xf32>
    %c0_59 = arith.constant 0 : index
    %c0_60 = arith.constant 0 : index
    %51 = vector.load %arg6[%c0_59, %c0_60] : memref<80x128xf32, #tpu.memory_space<vmem>>, vector<80x128xf32>
    %52 = arith.addf %51, %50 : vector<80x128xf32>
    %c0_61 = arith.constant 0 : index
    %c0_62 = arith.constant 0 : index
    %53 = vector.load %arg6[%c0_61, %c0_62] : memref<80x128xf32, #tpu.memory_space<vmem>>, vector<80x128xf32>
    tpu.vector_store %arg6[%c0_61, %c0_62], %52 {strides = array<i32>} : memref<80x128xf32, #tpu.memory_space<vmem>>, vector<80x128xf32>,
    %c0_63 = arith.constant 0 : index
    %c21 = arith.constant 21 : index
    %c0_64 = arith.constant 0 : index
    %54 = vector.load %arg1[%c0_63, %c21, %c0_64] : memref<1x104x128xbf16, #tpu.memory_space<vmem>>, vector<1x80x128xbf16>
    %55 = vector.shape_cast %54 : vector<1x80x128xbf16> to vector<80x128xbf16>
    %c7 = arith.constant 7 : index
    %c0_65 = arith.constant 0 : index
    %c0_66 = arith.constant 0 : index
    %56 = vector.load %arg2[%c7, %c0_65, %c0_66] : memref<9x128x128xbf16, #tpu.memory_space<vmem>>, vector<1x128x128xbf16>
    %57 = vector.shape_cast %56 : vector<1x128x128xbf16> to vector<128x128xbf16>
    %cst_67 = arith.constant dense<0.000000e+00> : vector<80x128xf32>
    %58 = tpu.matmul %55, %57, %cst_67 {dimension_numbers = #tpu.dot_dimension_numbers<[1], [0], [0], [1], [0, 0, 1, 1], [], []>} : vector<80x128xbf16>, vector<128x128xbf16>, vector<80x128xf32> -> vector<80x128xf32>
    %c0_68 = arith.constant 0 : index
    %c0_69 = arith.constant 0 : index
    %59 = vector.load %arg6[%c0_68, %c0_69] : memref<80x128xf32, #tpu.memory_space<vmem>>, vector<80x128xf32>
    %60 = arith.addf %59, %58 : vector<80x128xf32>
    %c0_70 = arith.constant 0 : index
    %c0_71 = arith.constant 0 : index
    %61 = vector.load %arg6[%c0_70, %c0_71] : memref<80x128xf32, #tpu.memory_space<vmem>>, vector<80x128xf32>
    tpu.vector_store %arg6[%c0_70, %c0_71], %60 {strides = array<i32>} : memref<80x128xf32, #tpu.memory_space<vmem>>, vector<80x128xf32>,
    %c0_72 = arith.constant 0 : index
    %c22 = arith.constant 22 : index
    %c0_73 = arith.constant 0 : index
    %62 = vector.load %arg1[%c0_72, %c22, %c0_73] : memref<1x104x128xbf16, #tpu.memory_space<vmem>>, vector<1x80x128xbf16>
    %63 = vector.shape_cast %62 : vector<1x80x128xbf16> to vector<80x128xbf16>
    %c8 = arith.constant 8 : index
    %c0_74 = arith.constant 0 : index
    %c0_75 = arith.constant 0 : index
    %64 = vector.load %arg2[%c8, %c0_74, %c0_75] : memref<9x128x128xbf16, #tpu.memory_space<vmem>>, vector<1x128x128xbf16>
    %65 = vector.shape_cast %64 : vector<1x128x128xbf16> to vector<128x128xbf16>
    %cst_76 = arith.constant dense<0.000000e+00> : vector<80x128xf32>
    %66 = tpu.matmul %63, %65, %cst_76 {dimension_numbers = #tpu.dot_dimension_numbers<[1], [0], [0], [1], [0, 0, 1, 1], [], []>} : vector<80x128xbf16>, vector<128x128xbf16>, vector<80x128xf32> -> vector<80x128xf32>
    %c0_77 = arith.constant 0 : index
    %c0_78 = arith.constant 0 : index
    %67 = vector.load %arg6[%c0_77, %c0_78] : memref<80x128xf32, #tpu.memory_space<vmem>>, vector<80x128xf32>
    %68 = arith.addf %67, %66 : vector<80x128xf32>
    %c0_79 = arith.constant 0 : index
    %c0_80 = arith.constant 0 : index
    %69 = vector.load %arg6[%c0_79, %c0_80] : memref<80x128xf32, #tpu.memory_space<vmem>>, vector<80x128xf32>
    tpu.vector_store %arg6[%c0_79, %c0_80], %68 {strides = array<i32>} : memref<80x128xf32, #tpu.memory_space<vmem>>, vector<80x128xf32>,
    %c0_81 = arith.constant 0 : index
    %c0_82 = arith.constant 0 : index
    %70 = vector.load %arg6[%c0_81, %c0_82] : memref<80x128xf32, #tpu.memory_space<vmem>>, vector<80x128xf32>
    %c0_83 = arith.constant 0 : index
    %c0_84 = arith.constant 0 : index
    %71 = vector.load %arg3[%c0_83, %c0_84] : memref<1x128xf32, #tpu.memory_space<vmem>>, vector<1x128xf32>
    %72 = vector.broadcast %71 : vector<1x128xf32> to vector<80x128xf32>
    %73 = arith.mulf %70, %72 : vector<80x128xf32>
    %c0_85 = arith.constant 0 : index
    %c0_86 = arith.constant 0 : index
    %74 = vector.load %arg4[%c0_85, %c0_86] : memref<1x128xf32, #tpu.memory_space<vmem>>, vector<1x128xf32>
    %75 = vector.broadcast %74 : vector<1x128xf32> to vector<80x128xf32>
    %76 = arith.addf %73, %75 : vector<80x128xf32>
    %cst_87 = arith.constant 0.000000e+00 : f32
    %77 = vector.broadcast %cst_87 : f32 to vector<80x128xf32>
    %78 = arith.maximumf %76, %77 : vector<80x128xf32>
    %79 = arith.truncf %78 : vector<80x128xf32> to vector<80x128xbf16>
    %c0_88 = arith.constant 0 : index
    %c0_89 = arith.constant 0 : index
    %c0_90 = arith.constant 0 : index
    %80 = vector.load %arg5[%c0_88, %c0_89, %c0_90] : memref<1x80x128xbf16, #tpu.memory_space<vmem>>, vector<1x80x128xbf16>
    %81 = vector.shape_cast %80 : vector<1x80x128xbf16> to vector<80x128xbf16>
    %82 = vector.shape_cast %79 : vector<80x128xbf16> to vector<1x80x128xbf16>
    tpu.vector_store %arg5[%c0_88, %c0_89, %c0_90], %82 {strides = array<i32>} : memref<1x80x128xbf16, #tpu.memory_space<vmem>>, vector<1x80x128xbf16>,
    return
  }
  func.func @transform_0(%arg0: i32) -> (i32, i32, i32) {
    %c0_i32 = arith.constant 0 : i32
    %c0_i32_0 = arith.constant 0 : i32
    %c0_i32_1 = arith.constant 0 : i32
    return %arg0, %c0_i32, %c0_i32_0 : i32, i32, i32
  }
  func.func @transform_1(%arg0: i32) -> (i32, i32, i32) {
    %c0_i32 = arith.constant 0 : i32
    %c0_i32_0 = arith.constant 0 : i32
    %c0_i32_1 = arith.constant 0 : i32
    %c0_i32_2 = arith.constant 0 : i32
    return %c0_i32, %c0_i32_0, %c0_i32_1 : i32, i32, i32
  }
  func.func @transform_2(%arg0: i32) -> (i32, i32) {
    %c0_i32 = arith.constant 0 : i32
    %c0_i32_0 = arith.constant 0 : i32
    %c0_i32_1 = arith.constant 0 : i32
    return %c0_i32, %c0_i32_0 : i32, i32
  }
  func.func @transform_3(%arg0: i32) -> (i32, i32) {
    %c0_i32 = arith.constant 0 : i32
    %c0_i32_0 = arith.constant 0 : i32
    %c0_i32_1 = arith.constant 0 : i32
    return %c0_i32, %c0_i32_0 : i32, i32
  }
  func.func @transform_4(%arg0: i32) -> (i32, i32, i32) {
    %c0_i32 = arith.constant 0 : i32
    %c0_i32_0 = arith.constant 0 : i32
    %c0_i32_1 = arith.constant 0 : i32
    return %arg0, %c0_i32, %c0_i32_0 : i32, i32, i32
  }
}

module attributes {stable_mosaic.version = 11 : i64} {
  func.func @kernel(%arg0: i32, %arg1: memref<128x128xbf16, #tpu.memory_space<vmem>>, %arg2: memref<128x128xbf16, #tpu.memory_space<vmem>>, %arg3: memref<1x128xf32, #tpu.memory_space<vmem>>, %arg4: memref<1x128xf32, #tpu.memory_space<vmem>>, %arg5: memref<128x128xbf16, #tpu.memory_space<vmem>>) attributes {dimension_semantics = [#tpu.dimension_semantics<parallel>], iteration_bounds = array<i64: 1>, scalar_prefetch = 0 : i64, scratch_operands = 0 : i64, tpu.core_type = #tpu.core_type<tc>, window_params = [{transform_indices = @transform_0, window_bounds = array<i64: 128, 128>}, {pipeline_mode = #tpu.pipeline_mode<synchronous>, transform_indices = @transform_1, window_bounds = array<i64: 128, 128>}, {pipeline_mode = #tpu.pipeline_mode<synchronous>, transform_indices = @transform_2, window_bounds = array<i64: 1, 128>}, {pipeline_mode = #tpu.pipeline_mode<synchronous>, transform_indices = @transform_3, window_bounds = array<i64: 1, 128>}, {transform_indices = @transform_4, window_bounds = array<i64: 128, 128>}]} {
    %c0 = arith.constant 0 : index
    %c0_0 = arith.constant 0 : index
    %0 = vector.load %arg1[%c0, %c0_0] : memref<128x128xbf16, #tpu.memory_space<vmem>>, vector<128x128xbf16>
    %c0_1 = arith.constant 0 : index
    %c0_2 = arith.constant 0 : index
    %1 = vector.load %arg2[%c0_1, %c0_2] : memref<128x128xbf16, #tpu.memory_space<vmem>>, vector<128x128xbf16>
    %cst = arith.constant dense<0.000000e+00> : vector<128x128xf32>
    %2 = tpu.matmul %0, %1, %cst {dimension_numbers = #tpu.dot_dimension_numbers<[1], [0], [0], [1], [0, 0, 1, 1], [], []>} : vector<128x128xbf16>, vector<128x128xbf16>, vector<128x128xf32> -> vector<128x128xf32>
    %c0_3 = arith.constant 0 : index
    %c0_4 = arith.constant 0 : index
    %3 = vector.load %arg3[%c0_3, %c0_4] : memref<1x128xf32, #tpu.memory_space<vmem>>, vector<1x128xf32>
    %4 = vector.broadcast %3 : vector<1x128xf32> to vector<128x128xf32>
    %5 = arith.mulf %2, %4 : vector<128x128xf32>
    %c0_5 = arith.constant 0 : index
    %c0_6 = arith.constant 0 : index
    %6 = vector.load %arg4[%c0_5, %c0_6] : memref<1x128xf32, #tpu.memory_space<vmem>>, vector<1x128xf32>
    %7 = vector.broadcast %6 : vector<1x128xf32> to vector<128x128xf32>
    %8 = arith.addf %5, %7 : vector<128x128xf32>
    %cst_7 = arith.constant 0.000000e+00 : f32
    %9 = vector.broadcast %cst_7 : f32 to vector<128x128xf32>
    %10 = arith.maximumf %8, %9 : vector<128x128xf32>
    %11 = arith.truncf %10 : vector<128x128xf32> to vector<128x128xbf16>
    %c0_8 = arith.constant 0 : index
    %c0_9 = arith.constant 0 : index
    %12 = vector.load %arg5[%c0_8, %c0_9] : memref<128x128xbf16, #tpu.memory_space<vmem>>, vector<128x128xbf16>
    tpu.vector_store %arg5[%c0_8, %c0_9], %11 {strides = array<i32>} : memref<128x128xbf16, #tpu.memory_space<vmem>>, vector<128x128xbf16>,
    return
  }
  func.func @transform_0(%arg0: i32) -> (i32, i32) {
    %c0_i32 = arith.constant 0 : i32
    %c0_i32_0 = arith.constant 0 : i32
    return %arg0, %c0_i32 : i32, i32
  }
  func.func @transform_1(%arg0: i32) -> (i32, i32) {
    %c0_i32 = arith.constant 0 : i32
    %c0_i32_0 = arith.constant 0 : i32
    %c0_i32_1 = arith.constant 0 : i32
    return %c0_i32, %c0_i32_0 : i32, i32
  }
  func.func @transform_2(%arg0: i32) -> (i32, i32) {
    %c0_i32 = arith.constant 0 : i32
    %c0_i32_0 = arith.constant 0 : i32
    %c0_i32_1 = arith.constant 0 : i32
    return %c0_i32, %c0_i32_0 : i32, i32
  }
  func.func @transform_3(%arg0: i32) -> (i32, i32) {
    %c0_i32 = arith.constant 0 : i32
    %c0_i32_0 = arith.constant 0 : i32
    %c0_i32_1 = arith.constant 0 : i32
    return %c0_i32, %c0_i32_0 : i32, i32
  }
  func.func @transform_4(%arg0: i32) -> (i32, i32) {
    %c0_i32 = arith.constant 0 : i32
    %c0_i32_0 = arith.constant 0 : i32
    return %arg0, %c0_i32 : i32, i32
  }
}

module attributes {stable_mosaic.version = 11 : i64} {
  func.func @_tail_down_kernel(%arg0: i32, %arg1: memref<32x128xbf16, #tpu.memory_space<vmem>>, %arg2: memref<128x128xbf16, #tpu.memory_space<vmem>>, %arg3: memref<1x128xf32, #tpu.memory_space<vmem>>, %arg4: memref<1x128xf32, #tpu.memory_space<vmem>>, %arg5: memref<32x128xbf16, #tpu.memory_space<vmem>>, %arg6: memref<128x128xbf16, #tpu.memory_space<vmem>>, %arg7: memref<1x128xf32, #tpu.memory_space<vmem>>, %arg8: memref<1x128xf32, #tpu.memory_space<vmem>>, %arg9: memref<32x128xbf16, #tpu.memory_space<vmem>>) attributes {dimension_semantics = [#tpu.dimension_semantics<parallel>], iteration_bounds = array<i64: 1>, scalar_prefetch = 0 : i64, scratch_operands = 0 : i64, tpu.core_type = #tpu.core_type<tc>, window_params = [{transform_indices = @transform_0, window_bounds = array<i64: 32, 128>}, {pipeline_mode = #tpu.pipeline_mode<synchronous>, transform_indices = @transform_1, window_bounds = array<i64: 128, 128>}, {pipeline_mode = #tpu.pipeline_mode<synchronous>, transform_indices = @transform_2, window_bounds = array<i64: 1, 128>}, {pipeline_mode = #tpu.pipeline_mode<synchronous>, transform_indices = @transform_3, window_bounds = array<i64: 1, 128>}, {transform_indices = @transform_4, window_bounds = array<i64: 32, 128>}, {pipeline_mode = #tpu.pipeline_mode<synchronous>, transform_indices = @transform_5, window_bounds = array<i64: 128, 128>}, {pipeline_mode = #tpu.pipeline_mode<synchronous>, transform_indices = @transform_6, window_bounds = array<i64: 1, 128>}, {pipeline_mode = #tpu.pipeline_mode<synchronous>, transform_indices = @transform_7, window_bounds = array<i64: 1, 128>}, {transform_indices = @transform_8, window_bounds = array<i64: 32, 128>}]} {
    %c0 = arith.constant 0 : index
    %c0_0 = arith.constant 0 : index
    %0 = vector.load %arg1[%c0, %c0_0] : memref<32x128xbf16, #tpu.memory_space<vmem>>, vector<32x128xbf16>
    %c0_1 = arith.constant 0 : index
    %c0_2 = arith.constant 0 : index
    %1 = vector.load %arg2[%c0_1, %c0_2] : memref<128x128xbf16, #tpu.memory_space<vmem>>, vector<128x128xbf16>
    %cst = arith.constant dense<0.000000e+00> : vector<32x128xf32>
    %2 = tpu.matmul %0, %1, %cst {dimension_numbers = #tpu.dot_dimension_numbers<[1], [0], [0], [1], [0, 0, 1, 1], [], []>} : vector<32x128xbf16>, vector<128x128xbf16>, vector<32x128xf32> -> vector<32x128xf32>
    %c0_3 = arith.constant 0 : index
    %c0_4 = arith.constant 0 : index
    %3 = vector.load %arg3[%c0_3, %c0_4] : memref<1x128xf32, #tpu.memory_space<vmem>>, vector<1x128xf32>
    %4 = vector.broadcast %3 : vector<1x128xf32> to vector<32x128xf32>
    %5 = arith.mulf %2, %4 : vector<32x128xf32>
    %c0_5 = arith.constant 0 : index
    %c0_6 = arith.constant 0 : index
    %6 = vector.load %arg4[%c0_5, %c0_6] : memref<1x128xf32, #tpu.memory_space<vmem>>, vector<1x128xf32>
    %7 = vector.broadcast %6 : vector<1x128xf32> to vector<32x128xf32>
    %8 = arith.addf %5, %7 : vector<32x128xf32>
    %c0_7 = arith.constant 0 : index
    %c0_8 = arith.constant 0 : index
    %9 = vector.load %arg5[%c0_7, %c0_8] : memref<32x128xbf16, #tpu.memory_space<vmem>>, vector<32x128xbf16>
    %c0_9 = arith.constant 0 : index
    %c0_10 = arith.constant 0 : index
    %10 = vector.load %arg6[%c0_9, %c0_10] : memref<128x128xbf16, #tpu.memory_space<vmem>>, vector<128x128xbf16>
    %cst_11 = arith.constant dense<0.000000e+00> : vector<32x128xf32>
    %11 = tpu.matmul %9, %10, %cst_11 {dimension_numbers = #tpu.dot_dimension_numbers<[1], [0], [0], [1], [0, 0, 1, 1], [], []>} : vector<32x128xbf16>, vector<128x128xbf16>, vector<32x128xf32> -> vector<32x128xf32>
    %c0_12 = arith.constant 0 : index
    %c0_13 = arith.constant 0 : index
    %12 = vector.load %arg7[%c0_12, %c0_13] : memref<1x128xf32, #tpu.memory_space<vmem>>, vector<1x128xf32>
    %13 = vector.broadcast %12 : vector<1x128xf32> to vector<32x128xf32>
    %14 = arith.mulf %11, %13 : vector<32x128xf32>
    %c0_14 = arith.constant 0 : index
    %c0_15 = arith.constant 0 : index
    %15 = vector.load %arg8[%c0_14, %c0_15] : memref<1x128xf32, #tpu.memory_space<vmem>>, vector<1x128xf32>
    %16 = vector.broadcast %15 : vector<1x128xf32> to vector<32x128xf32>
    %17 = arith.addf %14, %16 : vector<32x128xf32>
    %18 = arith.addf %8, %17 : vector<32x128xf32>
    %cst_16 = arith.constant 0.000000e+00 : f32
    %19 = vector.broadcast %cst_16 : f32 to vector<32x128xf32>
    %20 = arith.maximumf %18, %19 : vector<32x128xf32>
    %21 = arith.truncf %20 : vector<32x128xf32> to vector<32x128xbf16>
    %c0_17 = arith.constant 0 : index
    %c0_18 = arith.constant 0 : index
    %22 = vector.load %arg9[%c0_17, %c0_18] : memref<32x128xbf16, #tpu.memory_space<vmem>>, vector<32x128xbf16>
    tpu.vector_store %arg9[%c0_17, %c0_18], %21 {strides = array<i32>} : memref<32x128xbf16, #tpu.memory_space<vmem>>, vector<32x128xbf16>,
    return
  }
  func.func @transform_0(%arg0: i32) -> (i32, i32) {
    %c0_i32 = arith.constant 0 : i32
    %c0_i32_0 = arith.constant 0 : i32
    return %arg0, %c0_i32 : i32, i32
  }
  func.func @transform_1(%arg0: i32) -> (i32, i32) {
    %c0_i32 = arith.constant 0 : i32
    %c0_i32_0 = arith.constant 0 : i32
    %c0_i32_1 = arith.constant 0 : i32
    return %c0_i32, %c0_i32_0 : i32, i32
  }
  func.func @transform_2(%arg0: i32) -> (i32, i32) {
    %c0_i32 = arith.constant 0 : i32
    %c0_i32_0 = arith.constant 0 : i32
    %c0_i32_1 = arith.constant 0 : i32
    return %c0_i32, %c0_i32_0 : i32, i32
  }
  func.func @transform_3(%arg0: i32) -> (i32, i32) {
    %c0_i32 = arith.constant 0 : i32
    %c0_i32_0 = arith.constant 0 : i32
    %c0_i32_1 = arith.constant 0 : i32
    return %c0_i32, %c0_i32_0 : i32, i32
  }
  func.func @transform_4(%arg0: i32) -> (i32, i32) {
    %c0_i32 = arith.constant 0 : i32
    %c0_i32_0 = arith.constant 0 : i32
    return %arg0, %c0_i32 : i32, i32
  }
  func.func @transform_5(%arg0: i32) -> (i32, i32) {
    %c0_i32 = arith.constant 0 : i32
    %c0_i32_0 = arith.constant 0 : i32
    %c0_i32_1 = arith.constant 0 : i32
    return %c0_i32, %c0_i32_0 : i32, i32
  }
  func.func @transform_6(%arg0: i32) -> (i32, i32) {
    %c0_i32 = arith.constant 0 : i32
    %c0_i32_0 = arith.constant 0 : i32
    %c0_i32_1 = arith.constant 0 : i32
    return %c0_i32, %c0_i32_0 : i32, i32
  }
  func.func @transform_7(%arg0: i32) -> (i32, i32) {
    %c0_i32 = arith.constant 0 : i32
    %c0_i32_0 = arith.constant 0 : i32
    %c0_i32_1 = arith.constant 0 : i32
    return %c0_i32, %c0_i32_0 : i32, i32
  }
  func.func @transform_8(%arg0: i32) -> (i32, i32) {
    %c0_i32 = arith.constant 0 : i32
    %c0_i32_0 = arith.constant 0 : i32
    return %arg0, %c0_i32 : i32, i32
  }
}

</mosaic_0001>

<bundles_post_ra>
// kernel: tpu_custom_call.1
= control target key start
LH: loop header
LB: loop body
LE: loop exit
PB: predicated region body
PF: predicated region fallthrough
CT: control target
= control target key end

     0   :  { %7 = vsyncpa [#allocation3], 0  ;;  %s633_s0 = inlined_call_operand.hbm [shape: f32[16,128], index: 0, kind: input, shape index: {}]   ;;  %s634_s1 = inlined_call_operand.hbm [shape: f32[8,128], index: 1, kind: input, shape index: {}]   ;;  %s635_s2 = inlined_call_operand.hbm [shape: f32[16,128], index: 2, kind: output, shape index: {}]  }
   0x1   :  { %9 = vsyncpa [#allocation3 + $0x1], 0 }
   0x2   :  { %10 = vsyncpa [#allocation6], 0 }
   0x3   :  { %11 = vsyncpa [#allocation4], 0 }
   0x4   :  { %13 = vsyncpa [#allocation4 + $0x1], 0  ;;  %s495_s9 = smov 0   ;;  %s497_s10 = smov 0  }
   0x5   :  { %s499_s11 = smov 0   ;;  %s501_s12 = smov 0  }
   0x6 LB: > { %s516_s13 = sadd.s32 4294967295, %s477_s12   ;;  %s276_s14 = sadd.s32 4294967294, %s477_s12   ;;  %s477_s12 = sphi %s501_s12, %s645_s12   ;;  %s473_s11 = sphi %s499_s11, %s644_s11   ;;  %s469_s10 = sphi %s497_s10, %s643_s10   ;;  %s465_s9 = sphi %s495_s9, %s642_s9  }
   0x7   : > { %p39_p0 = scmp.ne.s32.totalorder %s469_s10, %s465_s9  ;;  %p40_p1 = scmp.eq.s32.totalorder %s516_s13, 0 }
   0x8   : > { %p84_p2 = scmp.eq.s32.totalorder %s516_s13, 1  ;;  %p90_p3 = scmp.eq.s32.totalorder %s276_s14, 1 }
   0x9   : > { %p525_p4 = por %p40_p1, %p39_p0  ;;  %p277_p5 = scmp.ge.s32.totalorder %s477_s12, 1 }
   0xa   : > { %p530_p6 = por %p90_p3, %p39_p0  ;;  %p97_p7 = scmp.lt.s32.totalorder %s477_s12, 3 }
   0xb   : > { %s109_s19 = sshll.u32 %s634_s1, 4  ;;  %s479_s21 = smov [#allocation5]   ;;  %s110_s19 = int_to_ptr.hbm [resolvable:$true] %s109_s19 }
   0xc   : > { %p538_p8 = pnand %p277_p5, %p97_p7  ;;  %s111_s22 = sshll.u32 %s479_s21, 4  ;;  %s112_s22 = int_to_ptr.vmem [resolvable:$true] %s111_s22 }
   0xd   : > { %s548_s23 = sadd.s32 1, %s477_s12   ;;  %s26_s24 = sadd.s32 1, %s473_s11 }
   0xe   : > { %p298_p10 = pneg %p538_p8  ;;  %s23_s25 = ssub.s32 %s477_s12, %s548_s23 }
   0xf   : > { %p24_p12 = scmp.eq.s32.totalorder %s23_s25, 0  ;;  %p33_p13 = scmp.ne.s32.totalorder %s473_s11, %s469_s10 }
  0x10   : > { %p299_p11 = pnand %p298_p10, %p40_p1  ;;  %p34_p0 = scmp.eq.s32.totalorder %s477_s12, 0 }
  0x11   : > { %s557_s26 = scalar_select %p24_p12, %s473_s11, %s26_s24  }
  0x12   : > { %301 = dma.hbm_to_vmem [thread:$0]  (!%p299_p11), %s110_s19, 128, %s112_s22, [#allocation6]  }
  0x13   : > { %p561_p3 = por %p84_p2, %p33_p13  ;;  %p311_p5 = scmp.lt.s32.totalorder %s477_s12, 2 }
  0x14   : > { %s122_s28 = sand.u32 1, %s473_s11   ;;  %s281_s29 = sshll.u32 %s477_s12, 3 }
  0x15   : > { %p35_p7 = por %p34_p0, %p33_p13  ;;  %s280_s30 = sshll.u32 %s122_s28, 3 }
  0x16   : > { %s130_s5 = scalar_lea.hbm %s633_s0, %s281_s29  ;;  %s126_s7 = scalar_lea.vmem [#allocation2], %s280_s30 }
  0x17   : > { %s132_s6 = sshll.u32 %s130_s5, 4  ;;  %s134_s8 = sshll.u32 %s126_s7, 4  ;;  %s133_s6 = int_to_ptr.hbm [resolvable:$true] %s132_s6  ;;  %s135_s8 = int_to_ptr.vmem [resolvable:$true] %s134_s8 }
  0x18   : > { %p571_p10 = pnand %p311_p5, %p35_p7  ;;  %s123_s17 = scalar_lea.sflag [#allocation3], %s122_s28 }
  0x19   : > { %s377_s18 = sshra.s32 %s133_s6, 4  ;;  %s384_s24 = scalar_lea.hbm %s633_s0, 16  ;;  %s378_s18 = int_to_ptr.hbm [resolvable:$true] %s377_s18 }
  0x1a   : > { %s379_s19 = scalar_lea.hbm %s378_s18, 8  ;;  %p381_p11 = pneg %p571_p10 }
  0x1b   : > { %p380_p2 = scmp.ne.s32.totalorder %s378_s18, %s379_s19  ;;  %p385_p0 = scmp.lt.s32.totalorder %s378_s18, %s633_s0 }
  0x1c   : > { %p386_p5 = scmp.lt.s32.totalorder %s384_s24, %s379_s19 }
  0x1d   : > { %p382_p12 = pnand %p381_p11, %p380_p2 }
  0x1e   : > { %p387_p7 = por %p386_p5, %p385_p0 }
  0x1f   : > { %p383_p13 = pneg %p382_p12 }
  0x21   : > { %p388_p9 = pnand %p387_p7, %p383_p13 }
  0x23   : > { %391 = shalt.err (!%p388_p9)
}
  0x24   : > { %305 = dma.hbm_to_vmem [thread:$0]  (!%p571_p10), %s133_s6, 128, %s135_s8, %s123_s17  }
  0x25   : > { %143 = sbr.rel (%p538_p8) target bundleno = 60 (0x3c), region = 28  ;;  %s588_s28 = sand.u32 (!%p538_p8), 1, %s469_s10  }
  0x26   : > { %s283_s30 = sshll.u32 (!%p538_p8), %s588_s28, 3  ;;  %s146_s3 = scalar_lea.sflag (!%p538_p8), [#allocation3], %s588_s28 }
  0x27   : > { %s149_s4 = scalar_lea.vmem (!%p538_p8), [#allocation2], %s283_s30 }
  0x2a   : > { %452 = dma.done.wait (%p525_p4), %s146_s3, 128  }
  0x2b   : > { %454 = vsyncadd (%p525_p4), %s146_s3, 4294967168 }
  0x2c   : > { %456 = dma.done.wait (%p40_p1), [#allocation6], 128  }
  0x2d   : > { %458 = vsyncadd (%p40_p1), [#allocation6], 4294967168  ;;  %s287_s20 = sshll.u32 %s516_s13, 3  ;;  %s175_s8 = scalar_lea.vmem [#allocation7], %s283_s30  ;;  %v176_v0 = vld [vmem:[%s149_s4] sm:$0xff]  ;;  %v177_v1 = vld [vmem:[#allocation5] sm:$0xff] }
  0x2e   : > { %s191_s7 = scalar_lea.hbm %s635_s2, %s287_s20  ;;  %s193_s14 = sshll.u32 %s175_s8, 4  ;;  %v178_v2 = vadd.f32 %v177_v1, %v176_v0  ;;  %s194_s14 = int_to_ptr.vmem [resolvable:$true] %s193_s14 }
  0x2f   : > { %s195_s17 = sshll.u32 %s191_s7, 4  ;;  %s181_s15 = scalar_lea.sflag [#allocation4], %s588_s28  ;;  %s196_s17 = int_to_ptr.hbm [resolvable:$true] %s195_s17 }
  0x30   : > { %179 = vst [vmem:[%s175_s8] sm:$0xff] %v178_v2  ;;  %s421_s18 = sshra.s32 %s196_s17, 4  ;;  %s427_s22 = scalar_lea.hbm %s635_s2, 16  ;;  %s422_s18 = int_to_ptr.hbm [resolvable:$true] %s421_s18 }
  0x31   : > { %s423_s19 = scalar_lea.hbm %s422_s18, 8  ;;  %p428_p9 = scmp.lt.s32.totalorder %s422_s18, %s635_s2 }
  0x32   : > { %p424_p1 = scmp.ne.s32.totalorder %s422_s18, %s423_s19  ;;  %p429_p10 = scmp.lt.s32.totalorder %s427_s22, %s423_s19 }
  0x34   : > { %p425_p4 = pnand %p424_p1, %p561_p3  ;;  %p430_p2 = por %p429_p10, %p428_p9 }
  0x36   : > { %p426_p8 = pneg %p425_p4 }
  0x38   : > { %p431_p11 = pnand %p430_p2, %p426_p8 }
  0x3a   : > { %434 = shalt.err (!%p431_p11)
}
  0x3b   : > { %296 = dma.vmem_to_hbm [thread:$0]  (%p561_p3), %s194_s14, 128, %s196_s17, %s181_s15  }
  0x3c PF: > { %s207_s29 = sand.u32 1, %s465_s9   ;;  %p641_p12 = scmp.ge.s32.totalorder %s477_s12, 2 }
  0x3d   : > { %s208_s28 = scalar_lea.sflag [#allocation4], %s207_s29 }
  0x3e   : > { %p307_p13 = pnand %p641_p12, %p530_p6 }
  0x40   : > { %p308_p0 = pneg %p307_p13 }
  0x42   : > { %460 = dma.done.wait (%p308_p0), %s208_s28, 128  }
  0x43   : > { %462 = vsyncadd (%p308_p0), %s208_s28, 4294967168  ;;  %p16_p5 = scmp.ge.s32.totalorder %s548_s23, 4   ;;  %s642_s9 = smov %s469_s10 }
  0x44   : > { %s643_s10 = smov %s473_s11  ;;  %s644_s11 = smov %s557_s26 }
  0x45   : > { %s645_s12 = smov %s548_s23  ;;  %18 = sbr.rel (!%p16_p5) target bundleno = 6 (0x6), region = 77 }
  0x4a   :  { %214 = vsyncpa [#allocation3], 1 }
  0x4b   :  { %216 = vsyncpa [#allocation3 + $0x1], 1 }
  0x4c   :  { %217 = vsyncpa [#allocation6], 1 }
  0x4d   :  { %218 = vsyncpa [#allocation4], 1 }
  0x4e   :  { %220 = vsyncpa [#allocation4 + $0x1], 1 }

// kernel: bottleneck_pallas.3
= control target key start
LH: loop header
LB: loop body
LE: loop exit
PB: predicated region body
PF: predicated region fallthrough
CT: control target
= control target key end

     0   :  { %s578_s1 = inlined_call_operand.vmem [shape: bf16[128,128], index: 1, kind: input, shape index: {}]   ;;  %s579_s2 = inlined_call_operand.vmem [shape: f32[1,128], index: 2, kind: input, shape index: {}]   ;;  %s580_s3 = inlined_call_operand.vmem [shape: f32[1,128], index: 3, kind: input, shape index: {}]   ;;  %s581_s0 = inlined_call_operand.vmem [shape: bf16[128,128], index: 0, kind: input, shape index: {}]   ;;  %s582_s4 = inlined_call_operand.vmem [shape: bf16[128,128], index: 4, kind: output, shape index: {}]  }
   0x1   :  { %v365_v0 = vld [vmem:[%s578_s1 + $0x38] sm:$0xff]  ;;  %v364_v1 = vld [vmem:[%s578_s1 + $0x30] sm:$0xff]  ;;  %v363_v2 = vld [vmem:[%s578_s1 + $0x28] sm:$0xff] }
   0x2   :  { %145 = vmatpush.bf16.msra.mxu0 %v365_v0  ;;  %413 = vmatpush.bf16.msra.mxu1 %v365_v0  ;;  %v362_v3 = vld [vmem:[%s578_s1 + $0x20] sm:$0xff]  ;;  %v361_v4 = vld [vmem:[%s578_s1 + $0x18] sm:$0xff]  ;;  %v360_v5 = vld [vmem:[%s578_s1 + $0x10] sm:$0xff] }
   0x3   :  { %414 = vmatpush.bf16.msra.mxu2 %v365_v0  ;;  %415 = vmatpush.bf16.msra.mxu3 %v365_v0  ;;  %v359_v6 = vld [vmem:[%s578_s1 + $0x8] sm:$0xff]  ;;  %v358_v7 = vld [vmem:[%s578_s1] sm:$0xff]  ;;  %v352_v9 = vld [vmem:[%s581_s0 + $0x10] sm:$0xff] }
   0x4   :  { %v350_v8 = vld [vmem:[%s581_s0] sm:$0xff]  ;;  %v356_v11 = vld [vmem:[%s581_s0 + $0x30] sm:$0xff]  ;;  %v351_v12 = vld [vmem:[%s581_s0 + $0x8] sm:$0xff] }
   0x5   :  { %v354_v10 = vld [vmem:[%s581_s0 + $0x20] sm:$0xff]  ;;  %v353_v13 = vld [vmem:[%s581_s0 + $0x18] sm:$0xff]  ;;  %v355_v14 = vld [vmem:[%s581_s0 + $0x28] sm:$0xff] }
   0x6   :  { %146 = vmatpush.bf16.msra.mxu0 %v364_v1  ;;  %416 = vmatpush.bf16.msra.mxu1 %v364_v1  ;;  %v357_v15 = vld [vmem:[%s581_s0 + $0x38] sm:$0xff]  ;;  %v515_v18 = vld [vmem:[%s579_s2] ss:$0 sm:$0xff] }
   0x7   :  { %417 = vmatpush.bf16.msra.mxu2 %v364_v1  ;;  %418 = vmatpush.bf16.msra.mxu3 %v364_v1  ;;  %v521_v20 = vld [vmem:[%s580_s3] ss:$0 sm:$0xff] }
   0xa   :  { %147 = vmatpush.bf16.msra.mxu0 %v363_v2  ;;  %419 = vmatpush.bf16.msra.mxu1 %v363_v2 }
   0xb   :  { %420 = vmatpush.bf16.msra.mxu2 %v363_v2  ;;  %421 = vmatpush.bf16.msra.mxu3 %v363_v2 }
   0xe   :  { %148 = vmatpush.bf16.msra.mxu0 %v362_v3  ;;  %422 = vmatpush.bf16.msra.mxu1 %v362_v3 }
   0xf   :  { %423 = vmatpush.bf16.msra.mxu2 %v362_v3  ;;  %424 = vmatpush.bf16.msra.mxu3 %v362_v3 }
  0x12   :  { %149 = vmatpush.bf16.msra.mxu0 %v361_v4  ;;  %425 = vmatpush.bf16.msra.mxu1 %v361_v4 }
  0x13   :  { %426 = vmatpush.bf16.msra.mxu2 %v361_v4  ;;  %427 = vmatpush.bf16.msra.mxu3 %v361_v4 }
  0x16   :  { %150 = vmatpush.bf16.msra.mxu0 %v360_v5  ;;  %428 = vmatpush.bf16.msra.mxu1 %v360_v5 }
  0x17   :  { %429 = vmatpush.bf16.msra.mxu2 %v360_v5  ;;  %430 = vmatpush.bf16.msra.mxu3 %v360_v5 }
  0x1a   :  { %151 = vmatpush.bf16.msra.mxu0 %v359_v6  ;;  %431 = vmatpush.bf16.msra.mxu1 %v359_v6 }
  0x1b   :  { %432 = vmatpush.bf16.msra.mxu2 %v359_v6  ;;  %433 = vmatpush.bf16.msra.mxu3 %v359_v6 }
  0x1e   :  { %152 = vmatpush.bf16.msra.mxu0 %v358_v7  ;;  %434 = vmatpush.bf16.msra.mxu1 %v358_v7 }
  0x1f   :  { %435 = vmatpush.bf16.msra.mxu2 %v358_v7  ;;  %436 = vmatpush.bf16.msra.mxu3 %v358_v7 }
  0x21   :  { %153 = vmatmul.bf16.vlgmr.msra.gmra.mxu0 %v350_v8  ;;  %163 = vmatmul.bf16.vlgmr.msra.gmra.mxu1 %v352_v9 }
  0x22   :  { %173 = vmatmul.bf16.vlgmr.msra.gmra.mxu2 %v354_v10  ;;  %183 = vmatmul.bf16.vlgmr.msra.gmra.mxu3 %v356_v11 }
  0x31   :  { %158 = vmatmul.bf16.gmra.mxu0 %v351_v12  ;;  %168 = vmatmul.bf16.gmra.mxu1 %v353_v13 }
  0x32   :  { %178 = vmatmul.bf16.gmra.mxu2 %v355_v14  ;;  %188 = vmatmul.bf16.gmra.mxu3 %v357_v15 }
  0x9e   :  { %v154_v16 = vpop.f32.mrf.mxu0  ;;  %v164_v17 = vpop.f32.mrf.mxu1 }
  0x9f   :  { %v198_v19 = vmul.f32 %v515_v18, %v154_v16  ;;  %v202_v21 = vmul.f32 %v515_v18, %v164_v17 }
  0xa1   :  { %v218_v26 = vadd.f32 %v521_v20, %v198_v19  ;;  %v222_v27 = vadd.f32 %v521_v20, %v202_v21 }
  0xa3   :  { %v234_v34 = vmax.f32 %v218_v26, 0.0  ;;  %v238_v35 = vmax.f32 %v222_v27, 0.0 }
  0xa5   :  { %v174_v22 = vpop.f32.mrf.mxu2  ;;  %v184_v23 = vpop.f32.mrf.mxu3 }
  0xa6   :  { %v156_v24 = vpop.f32.mrf.mxu0  ;;  %v166_v25 = vpop.f32.mrf.mxu1  ;;  %v206_v32 = vmul.f32 %v515_v18, %v174_v22  ;;  %v210_v33 = vmul.f32 %v515_v18, %v184_v23 }
  0xa7   :  { %v199_v28 = vmul.f32 %v515_v18, %v156_v24  ;;  %v203_v29 = vmul.f32 %v515_v18, %v166_v25 }
  0xa8   :  { %v226_v42 = vadd.f32 %v521_v20, %v206_v32  ;;  %v230_v43 = vadd.f32 %v521_v20, %v210_v33 }
  0xa9   :  { %v219_v30 = vadd.f32 %v521_v20, %v199_v28  ;;  %v223_v31 = vadd.f32 %v521_v20, %v203_v29 }
  0xaa   :  { %v242_v50 = vmax.f32 %v226_v42, 0.0  ;;  %v246_v51 = vmax.f32 %v230_v43, 0.0 }
  0xab   :  { %v235_v36 = vmax.f32 %v219_v30, 0.0  ;;  %v239_v37 = vmax.f32 %v223_v31, 0.0 }
  0xad   :  { %v369_v38 = vpack.c.bf16 %v235_v36, %v234_v34  ;;  %v379_v39 = vpack.c.bf16 %v239_v37, %v238_v35  ;;  %v176_v40 = vpop.f32.mrf.mxu2  ;;  %v186_v41 = vpop.f32.mrf.mxu3 }
  0xae   :  { %v207_v44 = vmul.f32 %v515_v18, %v176_v40  ;;  %v211_v45 = vmul.f32 %v515_v18, %v186_v41  ;;  %v159_v46 = vpop.f32.mrf.mxu0  ;;  %v169_v47 = vpop.f32.mrf.mxu1 }
  0xaf   :  { %370 = vst [vmem:[%s582_s4] sm:$0xff] %v369_v38   ;;  %v200_v54 = vmul.f32 %v515_v18, %v159_v46  ;;  %v204_v55 = vmul.f32 %v515_v18, %v169_v47 }
  0xb0   :  { %407 = vst [vmem:[%s582_s4 + $0x10] sm:$0xff] %v379_v39   ;;  %v227_v48 = vadd.f32 %v521_v20, %v207_v44  ;;  %v231_v49 = vadd.f32 %v521_v20, %v211_v45 }
  0xb1   :  { %v220_v62 = vadd.f32 %v521_v20, %v200_v54  ;;  %v224_v63 = vadd.f32 %v521_v20, %v204_v55 }
  0xb2   :  { %v243_v52 = vmax.f32 %v227_v48, 0.0  ;;  %v247_v53 = vmax.f32 %v231_v49, 0.0 }
  0xb3   :  { %v236_v6 = vmax.f32 %v220_v62, 0.0  ;;  %v240_v7 = vmax.f32 %v224_v63, 0.0 }
  0xb4   :  { %v389_v56 = vpack.c.bf16 %v243_v52, %v242_v50  ;;  %v399_v57 = vpack.c.bf16 %v247_v53, %v246_v51 }
  0xb5   :  { %v179_v58 = vpop.f32.mrf.mxu2  ;;  %v189_v59 = vpop.f32.mrf.mxu3 }
  0xb6   :  { %409 = vst [vmem:[%s582_s4 + $0x20] sm:$0xff] %v389_v56   ;;  %v161_v60 = vpop.f32.mrf.mxu0  ;;  %v171_v61 = vpop.f32.mrf.mxu1  ;;  %v208_v4 = vmul.f32 %v515_v18, %v179_v58  ;;  %v212_v5 = vmul.f32 %v515_v18, %v189_v59 }
  0xb7   :  { %411 = vst [vmem:[%s582_s4 + $0x30] sm:$0xff] %v399_v57   ;;  %v201_v0 = vmul.f32 %v515_v18, %v161_v60  ;;  %v205_v1 = vmul.f32 %v515_v18, %v171_v61 }
  0xb8   :  { %v228_v14 = vadd.f32 %v521_v20, %v208_v4  ;;  %v232_v15 = vadd.f32 %v521_v20, %v212_v5 }
  0xb9   :  { %v221_v2 = vadd.f32 %v521_v20, %v201_v0  ;;  %v225_v3 = vadd.f32 %v521_v20, %v205_v1 }
  0xba   :  { %v244_v22 = vmax.f32 %v228_v14, 0.0  ;;  %v248_v23 = vmax.f32 %v232_v15, 0.0 }
  0xbb   :  { %v237_v8 = vmax.f32 %v221_v2, 0.0  ;;  %v241_v9 = vmax.f32 %v225_v3, 0.0 }
  0xbd   :  { %v374_v10 = vpack.c.bf16 %v237_v8, %v236_v6  ;;  %v384_v11 = vpack.c.bf16 %v241_v9, %v240_v7  ;;  %v181_v12 = vpop.f32.mrf.mxu2  ;;  %v191_v13 = vpop.f32.mrf.mxu3 }
  0xbe   :  { %v209_v16 = vmul.f32 %v515_v18, %v181_v12  ;;  %v213_v17 = vmul.f32 %v515_v18, %v191_v13 }
  0xbf   :  { %406 = vst [vmem:[%s582_s4 + $0x8] sm:$0xff] %v374_v10  }
  0xc0   :  { %408 = vst [vmem:[%s582_s4 + $0x18] sm:$0xff] %v384_v11   ;;  %v229_v19 = vadd.f32 %v521_v20, %v209_v16  ;;  %v233_v21 = vadd.f32 %v521_v20, %v213_v17 }
  0xc2   :  { %v245_v24 = vmax.f32 %v229_v19, 0.0  ;;  %v249_v25 = vmax.f32 %v233_v21, 0.0 }
  0xc4   :  { %v394_v26 = vpack.c.bf16 %v245_v24, %v244_v22  ;;  %v404_v27 = vpack.c.bf16 %v249_v25, %v248_v23 }
  0xc6   :  { %410 = vst [vmem:[%s582_s4 + $0x28] sm:$0xff] %v394_v26  }
  0xc7   :  { %412 = vst [vmem:[%s582_s4 + $0x38] sm:$0xff] %v404_v27  }

// kernel: bottleneck_pallas.5
= control target key start
LH: loop header
LB: loop body
LE: loop exit
PB: predicated region body
PF: predicated region fallthrough
CT: control target
= control target key end

     0   :  { %s533_s1 = inlined_call_operand.vmem [shape: bf16[128,128], index: 1, kind: input, shape index: {}]   ;;  %s534_s5 = inlined_call_operand.vmem [shape: bf16[128,128], index: 5, kind: input, shape index: {}]   ;;  %s535_s2 = inlined_call_operand.vmem [shape: f32[1,128], index: 2, kind: input, shape index: {}]   ;;  %s536_s3 = inlined_call_operand.vmem [shape: f32[1,128], index: 3, kind: input, shape index: {}]   ;;  %s537_s0 = inlined_call_operand.vmem [shape: bf16[32,128], index: 0, kind: input, shape index: {}]   ;;  %s538_s4 = inlined_call_operand.vmem [shape: bf16[32,128], index: 4, kind: input, shape index: {}]   ;;  %s539_s6 = inlined_call_operand.vmem [shape: f32[1,128], index: 6, kind: input, shape index: {}]   ;;  %s540_s7 = inlined_call_operand.vmem [shape: f32[1,128], index: 7, kind: input, shape index: {}]   ;;  %s541_s8 = inlined_call_operand.vmem [shape: bf16[32,128], index: 8, kind: output, shape index: {}]  }
   0x1   :  { %v368_v0 = vld [vmem:[%s533_s1 + $0x38] sm:$0xff]  ;;  %v367_v2 = vld [vmem:[%s533_s1 + $0x30] sm:$0xff]  ;;  %v366_v4 = vld [vmem:[%s533_s1 + $0x28] sm:$0xff] }
   0x2   :  { %v378_v1 = vld [vmem:[%s534_s5 + $0x38] sm:$0xff]  ;;  %109 = vmatpush.bf16.msra.mxu0 %v368_v0  ;;  %390 = vmatpush.bf16.msra.mxu2 %v368_v0  ;;  %v377_v3 = vld [vmem:[%s534_s5 + $0x30] sm:$0xff]  ;;  %v376_v5 = vld [vmem:[%s534_s5 + $0x28] sm:$0xff] }
   0x3   :  { %224 = vmatpush.bf16.msra.mxu1 %v378_v1  ;;  %398 = vmatpush.bf16.msra.mxu3 %v378_v1  ;;  %v365_v6 = vld [vmem:[%s533_s1 + $0x20] sm:$0xff]  ;;  %v364_v8 = vld [vmem:[%s533_s1 + $0x18] sm:$0xff]  ;;  %v363_v10 = vld [vmem:[%s533_s1 + $0x10] sm:$0xff] }
   0x4   :  { %v375_v7 = vld [vmem:[%s534_s5 + $0x20] sm:$0xff]  ;;  %v374_v9 = vld [vmem:[%s534_s5 + $0x18] sm:$0xff]  ;;  %v373_v11 = vld [vmem:[%s534_s5 + $0x10] sm:$0xff] }
   0x5   :  { %v362_v12 = vld [vmem:[%s533_s1 + $0x8] sm:$0xff]  ;;  %v361_v14 = vld [vmem:[%s533_s1] sm:$0xff] }
   0x6   :  { %110 = vmatpush.bf16.msra.mxu0 %v367_v2  ;;  %391 = vmatpush.bf16.msra.mxu2 %v367_v2  ;;  %v372_v13 = vld [vmem:[%s534_s5 + $0x8] sm:$0xff]  ;;  %v371_v15 = vld [vmem:[%s534_s5] sm:$0xff] }
   0x7   :  { %225 = vmatpush.bf16.msra.mxu1 %v377_v3  ;;  %399 = vmatpush.bf16.msra.mxu3 %v377_v3  ;;  %v359_v16 = vld [vmem:[%s537_s0] sm:$0xff]  ;;  %v360_v17 = vld [vmem:[%s537_s0 + $0x8] sm:$0xff] }
   0x8   :  { %v369_v18 = vld [vmem:[%s538_s4] sm:$0xff]  ;;  %v370_v19 = vld [vmem:[%s538_s4 + $0x8] sm:$0xff] }
   0x9   :  { %v406_v21 = vld [vmem:[%s535_s2] ss:$0 sm:$0xff] }
   0xa   :  { %111 = vmatpush.bf16.msra.mxu0 %v366_v4  ;;  %392 = vmatpush.bf16.msra.mxu2 %v366_v4  ;;  %v408_v22 = vld [vmem:[%s539_s6] ss:$0 sm:$0xff] }
   0xb   :  { %226 = vmatpush.bf16.msra.mxu1 %v376_v5  ;;  %400 = vmatpush.bf16.msra.mxu3 %v376_v5  ;;  %v407_v25 = vld [vmem:[%s536_s3] ss:$0 sm:$0xff] }
   0xc   :  { %v409_v27 = vld [vmem:[%s540_s7] ss:$0 sm:$0xff] }
   0xe   :  { %112 = vmatpush.bf16.msra.mxu0 %v365_v6  ;;  %393 = vmatpush.bf16.msra.mxu2 %v365_v6 }
   0xf   :  { %227 = vmatpush.bf16.msra.mxu1 %v375_v7  ;;  %401 = vmatpush.bf16.msra.mxu3 %v375_v7 }
  0x12   :  { %113 = vmatpush.bf16.msra.mxu0 %v364_v8  ;;  %394 = vmatpush.bf16.msra.mxu2 %v364_v8 }
  0x13   :  { %228 = vmatpush.bf16.msra.mxu1 %v374_v9  ;;  %402 = vmatpush.bf16.msra.mxu3 %v374_v9 }
  0x16   :  { %114 = vmatpush.bf16.msra.mxu0 %v363_v10  ;;  %395 = vmatpush.bf16.msra.mxu2 %v363_v10 }
  0x17   :  { %229 = vmatpush.bf16.msra.mxu1 %v373_v11  ;;  %403 = vmatpush.bf16.msra.mxu3 %v373_v11 }
  0x1a   :  { %115 = vmatpush.bf16.msra.mxu0 %v362_v12  ;;  %396 = vmatpush.bf16.msra.mxu2 %v362_v12 }
  0x1b   :  { %230 = vmatpush.bf16.msra.mxu1 %v372_v13  ;;  %404 = vmatpush.bf16.msra.mxu3 %v372_v13 }
  0x1e   :  { %116 = vmatpush.bf16.msra.mxu0 %v361_v14  ;;  %397 = vmatpush.bf16.msra.mxu2 %v361_v14 }
  0x1f   :  { %231 = vmatpush.bf16.msra.mxu1 %v371_v15  ;;  %405 = vmatpush.bf16.msra.mxu3 %v371_v15 }
  0x21   :  { %117 = vmatmul.bf16.vlgmr.msra.gmra.mxu0 %v359_v16  ;;  %122 = vmatmul.bf16.vlgmr.msra.gmra.mxu2 %v360_v17 }
  0x22   :  { %232 = vmatmul.bf16.vlgmr.msra.gmra.mxu1 %v369_v18  ;;  %237 = vmatmul.bf16.vlgmr.msra.gmra.mxu3 %v370_v19 }
  0x9e   :  { %v118_v20 = vpop.f32.mrf.mxu0 }
  0x9f   :  { %v233_v23 = vpop.f32.mrf.mxu1  ;;  %v132_v24 = vmul.f32 %v406_v21, %v118_v20 }
  0xa0   :  { %v247_v26 = vmul.f32 %v408_v22, %v233_v23 }
  0xa1   :  { %v140_v30 = vadd.f32 %v407_v25, %v132_v24 }
  0xa2   :  { %v255_v31 = vadd.f32 %v409_v27, %v247_v26 }
  0xa4   :  { %v123_v28 = vpop.f32.mrf.mxu2  ;;  %v259_v39 = vadd.f32 %v255_v31, %v140_v30 }
  0xa5   :  { %v238_v29 = vpop.f32.mrf.mxu3  ;;  %v134_v35 = vmul.f32 %v406_v21, %v123_v28 }
  0xa6   :  { %v120_v32 = vpop.f32.mrf.mxu0  ;;  %v249_v36 = vmul.f32 %v408_v22, %v238_v29  ;;  %v263_v47 = vmax.f32 %v259_v39, 0.0 }
  0xa7   :  { %v133_v33 = vmul.f32 %v406_v21, %v120_v32  ;;  %v235_v34 = vpop.f32.mrf.mxu1  ;;  %v142_v41 = vadd.f32 %v407_v25, %v134_v35 }
  0xa8   :  { %v248_v37 = vmul.f32 %v408_v22, %v235_v34  ;;  %v257_v42 = vadd.f32 %v409_v27, %v249_v36 }
  0xa9   :  { %v141_v38 = vadd.f32 %v407_v25, %v133_v33 }
  0xaa   :  { %v256_v40 = vadd.f32 %v409_v27, %v248_v37  ;;  %v261_v51 = vadd.f32 %v257_v42, %v142_v41 }
  0xac   :  { %v260_v43 = vadd.f32 %v256_v40, %v141_v38  ;;  %v125_v44 = vpop.f32.mrf.mxu2  ;;  %v265_v55 = vmax.f32 %v261_v51, 0.0 }
  0xad   :  { %v135_v45 = vmul.f32 %v406_v21, %v125_v44  ;;  %v240_v46 = vpop.f32.mrf.mxu3 }
  0xae   :  { %v264_v48 = vmax.f32 %v260_v43, 0.0  ;;  %v250_v49 = vmul.f32 %v408_v22, %v240_v46 }
  0xaf   :  { %v143_v50 = vadd.f32 %v407_v25, %v135_v45 }
  0xb0   :  { %v382_v52 = vpack.c.bf16 %v264_v48, %v263_v47  ;;  %v258_v53 = vadd.f32 %v409_v27, %v250_v49 }
  0xb2   :  { %383 = vst [vmem:[%s541_s8] sm:$0xff] %v382_v52   ;;  %v262_v54 = vadd.f32 %v258_v53, %v143_v50 }
  0xb4   :  { %v266_v56 = vmax.f32 %v262_v54, 0.0 }
  0xb6   :  { %v387_v57 = vpack.c.bf16 %v266_v56, %v265_v55 }
  0xb8   :  { %389 = vst [vmem:[%s541_s8 + $0x8] sm:$0xff] %v387_v57  }

// kernel: bottleneck_pallas.4
= control target key start
LH: loop header
LB: loop body
LE: loop exit
PB: predicated region body
PF: predicated region fallthrough
CT: control target
= control target key end

     0   :  { %s2876_s15 = smov 0   ;;  %s3349_s0 = inlined_call_operand.vmem [shape: bf16[2,104,128], index: 0, kind: input, shape index: {}]   ;;  %s3350_s1 = inlined_call_operand.vmem [shape: bf16[9,128,128], index: 1, kind: input, shape index: {}]   ;;  %s3351_s2 = inlined_call_operand.vmem [shape: f32[1,128], index: 2, kind: input, shape index: {}]   ;;  %s3352_s3 = inlined_call_operand.vmem [shape: f32[1,128], index: 3, kind: input, shape index: {}]   ;;  %s3353_s4 = inlined_call_operand.vmem [shape: bf16[2,80,128], index: 4, kind: output, shape index: {}]  }
   0x1 LB: > { %s2064_s16 = sadd.s32 4294967295, %s2849_s15   ;;  %p2068_p0 = scmp.ge.s32.totalorder %s2849_s15, 1  ;;  %s2849_s15 = sphi %s2876_s15, %s14_s15  }
   0x2   : > { %p162_p1 = scmp.lt.s32.totalorder %s2849_s15, 3 }
   0x4   : > { %p163_p2 = pnand %p2068_p0, %p162_p1 }
   0x5   : > { %p188_p3 = scmp.lt.s32.totalorder (!%p163_p2), %s2064_s16, 1 }
   0x6   : > { %166 = sbr.rel (%p163_p2) target bundleno = 377 (0x179), region = 36 }
   0xb   : > { %v2681_v0 = vld [vmem:[%s3350_s1 + $0x38] sm:$0xff]  ;;  %v2680_v1 = vld [vmem:[%s3350_s1 + $0x30] sm:$0xff]  ;;  %v2679_v4 = vld [vmem:[%s3350_s1 + $0x28] sm:$0xff]  ;;  %s3355_s16 = smov (!%p188_p3, %s2064_s16), 1  ;;  %vm620_vm0 = vcmask 1046528   ;;  %vm1216_vm4 = vcmask 1045504  }
   0xc   : > { %302 = vmatpush.bf16.msra.mxu0 %v2681_v0  ;;  %2815 = vmatpush.bf16.msra.mxu1 %v2681_v0  ;;  %v2720_v2 = vld [vmem:[%s3350_s1 + $0xf8] sm:$0xff]  ;;  %v2719_v3 = vld [vmem:[%s3350_s1 + $0xf0] sm:$0xff]  ;;  %v2718_v5 = vld [vmem:[%s3350_s1 + $0xe8] sm:$0xff]  ;;  %s2831_s13 = smul.u32 52, %s3355_s16  ;;  %vm402_vm1 = vsmask.f32 7424 }
   0xd   : > { %2816 = vmatpush.bf16.msra.mxu2 %v2681_v0  ;;  %869 = vmatpush.bf16.msra.mxu3 %v2720_v2  ;;  %v2678_v6 = vld [vmem:[%s3350_s1 + $0x20] sm:$0xff]  ;;  %v2677_v8 = vld [vmem:[%s3350_s1 + $0x18] sm:$0xff]  ;;  %v2676_v10 = vld [vmem:[%s3350_s1 + $0x10] sm:$0xff]  ;;  %vm989_vm2 = vsmask.f32 6400  ;;  %vm1812_vm5 = vcmask 1044480  }
   0xe   : > { %v2717_v7 = vld [vmem:[%s3350_s1 + $0xe0] sm:$0xff]  ;;  %v2716_v9 = vld [vmem:[%s3350_s1 + $0xd8] sm:$0xff]  ;;  %v2715_v11 = vld [vmem:[%s3350_s1 + $0xd0] sm:$0xff]  ;;  %s2929_s22 = scalar_lea.vmem %s3349_s0, %s2831_s13  ;;  %vm1585_vm3 = vsmask.f32 5376  ;;  %s2832_s29 = smul.u32 40, %s3355_s16 }
   0xf   : > { %v2675_v12 = vld [vmem:[%s3350_s1 + $0x8] sm:$0xff]  ;;  %v2277_v13 = vld [vmem:[%s2929_s22 + $0x4] sm:$0xe]  ;;  %v2694_v19 = vld [vmem:[%s3350_s1 + $0x78] sm:$0xff] }
  0x10   : > { %303 = vmatpush.bf16.msra.mxu0 %v2680_v1  ;;  %2817 = vmatpush.bf16.msra.mxu1 %v2680_v1  ;;  %v2708_v14 = vld [vmem:[%s2929_s22 + $0x4] sm:$0xf0]  ;;  %v2674_v16 = vld [vmem:[%s3350_s1] sm:$0xff]  ;;  %v2940_v17 = vld [vmem:[%s2929_s22 + $0xc] sm:$0xff]  ;;  %s3316_s6 = scalar_lea.vmem %s3353_s4, %s2832_s29 }
  0x11   : > { %2818 = vmatpush.bf16.msra.mxu2 %v2680_v1  ;;  %870 = vmatpush.bf16.msra.mxu3 %v2719_v3  ;;  %v2714_v15 = vld [vmem:[%s3350_s1 + $0xc8] sm:$0xff]  ;;  %v2278_v18 = vor.u32 %v2708_v14, %v2277_v13  ;;  %v2707_v20 = vld [vmem:[%s3350_s1 + $0xb8] sm:$0xff]  ;;  %v2669_v22 = vld [vmem:[%s2929_s22] sm:$0xff]  ;;  %v806_v27 = vrot.slane %v2940_v17, 1 }
  0x12   : > { %v2733_v21 = vld [vmem:[%s3350_s1 + $0x138] sm:$0xff]  ;;  %v2671_v23 = vld [vmem:[%s2929_s22 + $0x10] sm:$0xff]  ;;  %v2673_v24 = vld [vmem:[%s2929_s22 + $0x20] sm:$0xff] }
  0x13   : > { %v2713_v25 = vld [vmem:[%s3350_s1 + $0xc0] sm:$0xff]  ;;  %v805_v26 = vrot.slane %v2278_v18, 1  ;;  %v2693_v28 = vld [vmem:[%s3350_s1 + $0x70] sm:$0xff]  ;;  %v2772_v29 = vld [vmem:[%s3350_s1 + $0x1f8] sm:$0xff] }
  0x14   : > { %304 = vmatpush.bf16.msra.mxu0 %v2679_v4  ;;  %2819 = vmatpush.bf16.msra.mxu1 %v2679_v4  ;;  %v2706_v30 = vld [vmem:[%s3350_s1 + $0xb0] sm:$0xff]  ;;  %v2692_v33 = vld [vmem:[%s3350_s1 + $0x68] sm:$0xff]  ;;  %v2691_v37 = vld [vmem:[%s3350_s1 + $0x60] sm:$0xff] }
  0x15   : > { %2820 = vmatpush.bf16.msra.mxu2 %v2679_v4  ;;  %871 = vmatpush.bf16.msra.mxu3 %v2718_v5  ;;  %v2732_v31 = vld [vmem:[%s3350_s1 + $0x130] sm:$0xff]  ;;  %v807_v32 = vsel %vm620_vm0, %v805_v26, %v806_v27  ;;  %v2705_v35 = vld [vmem:[%s3350_s1 + $0xa8] sm:$0xff]  ;;  %v2704_v38 = vld [vmem:[%s3350_s1 + $0xa0] sm:$0xff] }
  0x16   : > { %v2771_v34 = vld [vmem:[%s3350_s1 + $0x1f0] sm:$0xff]  ;;  %v2731_v36 = vld [vmem:[%s3350_s1 + $0x128] sm:$0xff]  ;;  %v2730_v39 = vld [vmem:[%s3350_s1 + $0x120] sm:$0xff] }
  0x17   : > { %v2345_v40 = vld [vmem:[%s2929_s22 + $0x4] sm:$0xe]  ;;  %v2721_v41 = vld [vmem:[%s2929_s22 + $0x4] sm:$0xf0]  ;;  %v2997_v42 = vld [vmem:[%s2929_s22 + $0x14] sm:$0xff] }
  0x18   : > { %305 = vmatpush.bf16.msra.mxu0 %v2678_v6  ;;  %2821 = vmatpush.bf16.msra.mxu1 %v2678_v6  ;;  %v2690_v43 = vld [vmem:[%s3350_s1 + $0x58] sm:$0xff]  ;;  %v2670_v46 = vld [vmem:[%s2929_s22 + $0x8] sm:$0xff]  ;;  %v2682_v48 = vld [vmem:[%s2929_s22] sm:$0xff]  ;;  %v2346_v49 = vor.u32 %v2721_v41, %v2345_v40  ;;  %v808_v51 = vrot.slane %v2997_v42, 1 }
  0x19   : > { %2822 = vmatpush.bf16.msra.mxu2 %v2678_v6  ;;  %872 = vmatpush.bf16.msra.mxu3 %v2717_v7  ;;  %v2703_v44 = vld [vmem:[%s3350_s1 + $0x98] sm:$0xff]  ;;  %v2722_v50 = vld [vmem:[%s2929_s22 + $0xc] sm:$0xff]  ;;  %v2209_v55 = vld [vmem:[%s2929_s22] sm:$0xe]  ;;  %v406_v58 = vshll.u32 %v2682_v48, 16  ;;  %v404_v6 = vshrl.u32 %v2682_v48, 16 }
  0x1a   : > { %v2729_v45 = vld [vmem:[%s3350_s1 + $0x118] sm:$0xff]  ;;  %v2689_v52 = vld [vmem:[%s3350_s1 + $0x50] sm:$0xff]  ;;  %v2695_v56 = vld [vmem:[%s2929_s22] sm:$0xf0]  ;;  %v991_v59 = vshrl.u32 %v2346_v49, 16  ;;  %v994_v61 = vshll.u32 %v2346_v49, 16  ;;  %v809_v0 = vsel %vm620_vm0, %v806_v27, %v808_v51 }
  0x1b   : > { %v2672_v47 = vld [vmem:[%s2929_s22 + $0x18] sm:$0xff]  ;;  %v2702_v53 = vld [vmem:[%s3350_s1 + $0x90] sm:$0xff]  ;;  %v3025_v57 = vld [vmem:[%s2929_s22 + $0x8] sm:$0xff]  ;;  %v999_v62 = vshrl.u32 %v2722_v50, 16  ;;  %v1002_v63 = vshll.u32 %v2722_v50, 16  ;;  %v2210_v5 = vor.u32 %v2695_v56, %v2209_v55  ;;  %v408_v7 = vrot.slane %v406_v58, 1 }
  0x1c   : > { %306 = vmatpush.bf16.msra.mxu0 %v2677_v8  ;;  %2823 = vmatpush.bf16.msra.mxu1 %v2677_v8  ;;  %v2728_v54 = vld [vmem:[%s3350_s1 + $0x110] sm:$0xff]  ;;  %v2770_v60 = vld [vmem:[%s3350_s1 + $0x1e8] sm:$0xff]  ;;  %v2687_v13 = vld [vmem:[%s3350_s1 + $0x40] sm:$0xff] }
  0x1d   : > { %2824 = vmatpush.bf16.msra.mxu2 %v2677_v8  ;;  %873 = vmatpush.bf16.msra.mxu3 %v2716_v9  ;;  %v2688_v1 = vld [vmem:[%s3350_s1 + $0x48] sm:$0xff]  ;;  %v411_v8 = vshll.u32 %v3025_v57, 16  ;;  %v993_v9 = vrot.slane %v991_v59, 1  ;;  %v2700_v14 = vld [vmem:[%s3350_s1 + $0x80] sm:$0xff]  ;;  %v2759_v18 = vld [vmem:[%s3350_s1 + $0x1b8] sm:$0xff] }
  0x1e   : > { %v2701_v2 = vld [vmem:[%s3350_s1 + $0x88] sm:$0xff]  ;;  %v2726_v17 = vld [vmem:[%s3350_s1 + $0x100] sm:$0xff]  ;;  %v2755_v55 = vld [vmem:[%s3350_s1 + $0x198] sm:$0xff] }
  0x1f   : > { %v2727_v3 = vld [vmem:[%s3350_s1 + $0x108] sm:$0xff]  ;;  %v2756_v48 = vld [vmem:[%s3350_s1 + $0x1a0] sm:$0xff] }
  0x20   : > { %307 = vmatpush.bf16.msra.mxu0 %v2676_v10  ;;  %2825 = vmatpush.bf16.msra.mxu1 %v2676_v10  ;;  %v3045_v4 = vld [vmem:[%s2929_s22 + $0x8] sm:$0xff]  ;;  %v2743_v49 = vld [vmem:[%s3350_s1 + $0x160] sm:$0xff] }
  0x21   : > { %2826 = vmatpush.bf16.msra.mxu2 %v2676_v10  ;;  %874 = vmatpush.bf16.msra.mxu3 %v2715_v11  ;;  %v996_v10 = vrot.slane %v994_v61, 2  ;;  %v1001_v11 = vrot.slane %v999_v62, 1  ;;  %v2783_v41 = vld [vmem:[%s3350_s1 + $0x228] sm:$0xff]  ;;  %v2782_v50 = vld [vmem:[%s3350_s1 + $0x220] sm:$0xff] }
  0x22   : > { %v3126_v56 = vld [vmem:[%s2929_s22 + $0x24] sm:$0xff]  ;;  %v2724_v61 = vld [vmem:[%s2929_s22 + $0x1c] sm:$0xff] }
  0x23   : > { %v812_v62 = vrot.slane %v3126_v56, 1 }
  0x24   : > { %308 = vmatpush.bf16.msra.mxu0 %v2675_v12  ;;  %2827 = vmatpush.bf16.msra.mxu1 %v2675_v12 }
  0x25   : > { %2828 = vmatpush.bf16.msra.mxu2 %v2675_v12  ;;  %875 = vmatpush.bf16.msra.mxu3 %v2714_v15  ;;  %v1004_v12 = vrot.slane %v1002_v63, 2  ;;  %v621_v15 = vrot.slane %v2210_v5, 1  ;;  %v2754_v63 = vld [vmem:[%s3350_s1 + $0x190] sm:$0xff]  ;;  %v1020_v5 = vshll.u32 %v2724_v61, 16 }
  0x28   : > { %309 = vmatpush.bf16.msra.mxu0 %v2674_v16  ;;  %2829 = vmatpush.bf16.msra.mxu1 %v2674_v16 }
  0x29   : > { %2830 = vmatpush.bf16.msra.mxu2 %v2674_v16  ;;  %876 = vmatpush.bf16.msra.mxu3 %v2713_v25  ;;  %v622_v16 = vrot.slane %v3045_v4, 1  ;;  %v3068_v25 = vld [vmem:[%s2929_s22 + $0x1c] sm:$0xff]  ;;  %v1017_v4 = vshrl.u32 %v2724_v61, 16 }
  0x2b   : > { %310 = vmatmul.bf16.vlgmr.msra.gmra.mxu0 %v2669_v22  ;;  %320 = vmatmul.bf16.vlgmr.msra.gmra.mxu1 %v2671_v23  ;;  %v997_v22 = vor.u32 %v996_v10, %v993_v9  ;;  %v1005_v23 = vor.u32 %v1004_v12, %v1001_v11  ;;  %v623_v26 = vsel %vm620_vm0, %v621_v15, %v622_v16  ;;  %v759_v9 = vld [vmem:[%s2929_s22 + $0x2c] sm:$0x1]  ;;  %v3165_v11 = vld [vmem:[%s2929_s22 + $0x18] sm:$0xff]  ;;  %v1022_v15 = vrot.slane %v1020_v5, 2 }
  0x2c   : > { %500 = vmatpush.bf16.msrb.mxu1 %v2694_v19  ;;  %1096 = vmatpush.bf16.msrb.mxu0 %v2733_v21  ;;  %v2746_v19 = vld [vmem:[%s3350_s1 + $0x178] sm:$0xff]  ;;  %v413_v21 = vrot.slane %v411_v8, 1  ;;  %v2780_v8 = vld [vmem:[%s3350_s1 + $0x210] sm:$0xff]  ;;  %v2766_v10 = vld [vmem:[%s3350_s1 + $0x1c8] sm:$0xff] }
  0x2d   : > { %685 = vmatpush.bf16.msrb.mxu2 %v2707_v20  ;;  %1692 = vmatpush.bf16.msrb.mxu3 %v2772_v29  ;;  %v409_v20 = vor.u32 %v408_v7, %v404_v6  ;;  %v2758_v29 = vld [vmem:[%s3350_s1 + $0x1b0] sm:$0xff]  ;;  %v2753_v7 = vld [vmem:[%s3350_s1 + $0x188] sm:$0xff] }
  0x2e   : > { %330 = vmatmul.bf16.vlgmr.msra.gmra.mxu2 %v2673_v24  ;;  %877 = vmatmul.bf16.vlgmr.msra.gmra.mxu3 %v807_v32  ;;  %v2785_v24 = vld [vmem:[%s3350_s1 + $0x238] sm:$0xff]  ;;  %v810_v32 = vrot.slane %v3068_v25, 1 }
  0x2f   : > { %v414_v27 = vsel %vm402_vm1, %v409_v20, %v413_v21 }
  0x30   : > { %501 = vmatpush.bf16.msrb.mxu1 %v2693_v28  ;;  %1097 = vmatpush.bf16.msrb.mxu0 %v2732_v31  ;;  %v1006_v28 = vsel %vm989_vm2, %v997_v22, %v1005_v23  ;;  %v2723_v31 = vld [vmem:[%s2929_s22 + $0x14] sm:$0xff]  ;;  %v811_v40 = vsel %vm620_vm0, %v808_v51, %v810_v32  ;;  %v813_v6 = vsel %vm620_vm0, %v810_v32, %v812_v62 }
  0x31   : > { %686 = vmatpush.bf16.msrb.mxu2 %v2706_v30  ;;  %1693 = vmatpush.bf16.msrb.mxu3 %v2771_v34  ;;  %v2745_v30 = vld [vmem:[%s3350_s1 + $0x170] sm:$0xff]  ;;  %v2769_v34 = vld [vmem:[%s3350_s1 + $0x1e0] sm:$0xff] }
  0x34   : > { %502 = vmatpush.bf16.msrb.mxu1 %v2692_v33  ;;  %1098 = vmatpush.bf16.msrb.mxu0 %v2731_v36  ;;  %v2784_v33 = vld [vmem:[%s3350_s1 + $0x230] sm:$0xff]  ;;  %v1008_v36 = vshrl.u32 %v2723_v31, 16 }
  0x35   : > { %687 = vmatpush.bf16.msrb.mxu2 %v2705_v35  ;;  %1694 = vmatpush.bf16.msrb.mxu3 %v2770_v60  ;;  %v3090_v35 = vld [vmem:[%s2929_s22 + $0x10] sm:$0xff] }
  0x36   : > { %v1010_v42 = vrot.slane %v1008_v36, 1  ;;  %v423_v12 = vshrl.u32 %v3090_v35, 16 }
  0x38   : > { %503 = vmatpush.bf16.msrb.mxu1 %v2691_v37  ;;  %1099 = vmatpush.bf16.msrb.mxu0 %v2730_v39  ;;  %v1011_v37 = vshll.u32 %v2723_v31, 16  ;;  %v2744_v39 = vld [vmem:[%s3350_s1 + $0x168] sm:$0xff] }
  0x39   : > { %688 = vmatpush.bf16.msrb.mxu2 %v2704_v38  ;;  %v2757_v38 = vld [vmem:[%s3350_s1 + $0x1a8] sm:$0xff]  ;;  %1695 = vmatpush.bf16.msrb.mxu3 %v2769_v34 }
  0x3a   : > { %v2779_v34 = vld [vmem:[%s3350_s1 + $0x208] sm:$0xff] }
  0x3b   : > { %315 = vmatmul.bf16.gmra.mxu0 %v2670_v46  ;;  %325 = vmatmul.bf16.gmra.mxu1 %v2672_v47  ;;  %v419_v46 = vshll.u32 %v3090_v35, 16  ;;  %v1013_v47 = vrot.slane %v1011_v37, 2  ;;  %v2765_v35 = vld [vmem:[%s3350_s1 + $0x1c0] sm:$0xff] }
  0x3c   : > { %504 = vmatpush.bf16.msrb.mxu1 %v2690_v43  ;;  %1100 = vmatpush.bf16.msrb.mxu0 %v2729_v45  ;;  %v2768_v43 = vld [vmem:[%s3350_s1 + $0x1d8] sm:$0xff]  ;;  %v415_v45 = vshrl.u32 %v3025_v57, 16  ;;  %v2739_v37 = vld [vmem:[%s3350_s1 + $0x140] sm:$0xff] }
  0x3d   : > { %689 = vmatpush.bf16.msrb.mxu2 %v2703_v44  ;;  %v3108_v44 = vld [vmem:[%s2929_s22 + $0x10] sm:$0xff]  ;;  %1696 = vmatpush.bf16.msrb.mxu3 %v2768_v43  ;;  %v2742_v57 = vld [vmem:[%s3350_s1 + $0x158] sm:$0xff] }
  0x3e   : > { %882 = vmatmul.bf16.gmra.mxu3 %v809_v0  ;;  %v624_v51 = vrot.slane %v3108_v44, 1  ;;  %v2781_v0 = vld [vmem:[%s3350_s1 + $0x218] sm:$0xff] }
  0x40   : > { %505 = vmatpush.bf16.msrb.mxu1 %v2689_v52  ;;  %1101 = vmatpush.bf16.msrb.mxu0 %v2728_v54  ;;  %v417_v52 = vor.u32 %v415_v45, %v413_v21  ;;  %v1014_v54 = vor.u32 %v1013_v47, %v1010_v42  ;;  %v625_v58 = vsel %vm620_vm0, %v622_v16, %v624_v51  ;;  %v798_v16 = vunpack.c.l.b16 %v759_v9 }
  0x41   : > { %690 = vmatpush.bf16.msrb.mxu2 %v2702_v53  ;;  %v421_v53 = vrot.slane %v419_v46, 1  ;;  %v943_v46 = vld [vmem:[%s2929_s22 + $0x2c] sm:$0x3] }
  0x42   : > { %v1015_v60 = vsel %vm989_vm2, %v1005_v23, %v1014_v54  ;;  %v804_v21 = vpack.c.b16 %v798_v16, %v798_v16  ;;  %v2725_v23 = vld [vmem:[%s2929_s22 + $0x24] sm:$0xff] }
  0x43   : > { %v422_v59 = vsel %vm402_vm1, %v417_v52, %v421_v53  ;;  %v1026_v31 = vshrl.u32 %v2725_v23, 16  ;;  %v1029_v32 = vshll.u32 %v2725_v23, 16 }
  0x44   : > { %506 = vmatpush.bf16.msrb.mxu1 %v2688_v1  ;;  %1102 = vmatpush.bf16.msrb.mxu0 %v2727_v3  ;;  %v2767_v1 = vld [vmem:[%s3350_s1 + $0x1d0] sm:$0xff]  ;;  %v3151_v3 = vld [vmem:[%s2929_s22 + $0x18] sm:$0xff] }
  0x45   : > { %691 = vmatpush.bf16.msrb.mxu2 %v2701_v2  ;;  %v2741_v2 = vld [vmem:[%s3350_s1 + $0x150] sm:$0xff]  ;;  %1697 = vmatpush.bf16.msrb.mxu3 %v2767_v1  ;;  %v1028_v44 = vrot.slane %v1026_v31, 1  ;;  %v1031_v45 = vrot.slane %v1029_v32, 2  ;;  %v2734_v31 = vld [vmem:[%s2929_s22 + $0x4] sm:$0xf0] }
  0x48   : > { %507 = vmatpush.bf16.msrb.mxu1 %v2687_v13  ;;  %1103 = vmatpush.bf16.msrb.mxu0 %v2726_v17  ;;  %v427_v13 = vshll.u32 %v3151_v3, 16  ;;  %v626_v17 = vrot.slane %v3165_v11, 1 }
  0x49   : > { %692 = vmatpush.bf16.msrb.mxu2 %v2700_v14  ;;  %v1019_v14 = vrot.slane %v1017_v4, 1  ;;  %1698 = vmatpush.bf16.msrb.mxu3 %v2766_v10  ;;  %v2762_v10 = vld [vmem:[%s2929_s22 + $0x18] sm:$0xff] }
  0x4a   : > { %v627_v22 = vsel %vm620_vm0, %v624_v51, %v626_v17  ;;  %v1604_v16 = vshrl.u32 %v2762_v10, 16 }
  0x4b   : > { %508 = vmatmul.bf16.vlgmr.msrb.gmra.mxu1 %v414_v27  ;;  %1104 = vmatmul.bf16.vlgmr.msrb.gmra.mxu0 %v1006_v28  ;;  %v1023_v20 = vor.u32 %v1022_v15, %v1019_v14  ;;  %v2740_v27 = vld [vmem:[%s3350_s1 + $0x148] sm:$0xff] }
  0x4c   : > { %1281 = vmatpush.bf16.msra.mxu1 %v2746_v19  ;;  %1877 = vmatpush.bf16.msra.mxu0 %v2785_v24  ;;  %v429_v19 = vrot.slane %v427_v13, 1  ;;  %v2549_v28 = vld [vmem:[%s2929_s22 + $0x8] sm:$0xc] }
  0x4d   : > { %1465 = vmatpush.bf16.msra.mxu2 %v2759_v18  ;;  %v425_v18 = vor.u32 %v423_v12, %v421_v53  ;;  %v1024_v25 = vsel %vm989_vm2, %v1014_v54, %v1023_v20  ;;  %1699 = vmatpush.bf16.msrb.mxu3 %v2765_v35  ;;  %v1032_v53 = vor.u32 %v1031_v45, %v1028_v44  ;;  %v982_v54 = vunpack.c.l.b16 %v943_v46  ;;  %v2773_v35 = vld [vmem:[%s2929_s22 + $0x8] sm:$0xf0] }
  0x4e   : > { %693 = vmatmul.bf16.vlgmr.msrb.gmra.mxu2 %v623_v26  ;;  %887 = vmatmul.bf16.gmra.mxu3 %v811_v40  ;;  %v814_v26 = vrot.slane %v804_v21, 1  ;;  %v2699_v40 = vld [vmem:[%s2929_s22 + $0x20] sm:$0xff] }
  0x4f   : > { %v430_v24 = vsel %vm402_vm1, %v425_v18, %v429_v19  ;;  %v1033_v1 = vsel %vm989_vm2, %v1023_v20, %v1032_v53 }
  0x50   : > { %1282 = vmatpush.bf16.msra.mxu1 %v2745_v30  ;;  %1878 = vmatpush.bf16.msra.mxu0 %v2784_v33  ;;  %v3180_v30 = vld [vmem:[%s2929_s22 + $0x20] sm:$0xff]  ;;  %v815_v36 = vsel %vm620_vm0, %v812_v62, %v814_v26  ;;  %v574_v62 = vld [vmem:[%s2929_s22 + $0x28] sm:$0x1] }
  0x51   : > { %1466 = vmatpush.bf16.msra.mxu2 %v2758_v29  ;;  %v2760_v29 = vld [vmem:[%s2929_s22 + $0x8] sm:$0xf0]  ;;  %v2752_v33 = vld [vmem:[%s3350_s1 + $0x180] sm:$0xff]  ;;  %v435_v43 = vshll.u32 %v3180_v30, 16  ;;  %v613_v5 = vunpack.c.l.b16 %v574_v62  ;;  %v439_v12 = vshrl.u32 %v3180_v30, 16 }
  0x52   : > { %v2413_v30 = vld [vmem:[%s2929_s22 + $0x4] sm:$0xc] }
  0x53   : > { %v437_v52 = vrot.slane %v435_v43, 1  ;;  %v619_v11 = vpack.c.b16 %v613_v5, %v613_v5  ;;  %v1539_v5 = vld [vmem:[%s2929_s22 + $0x30] sm:$0x7] }
  0x54   : > { %1283 = vmatpush.bf16.msra.mxu1 %v2744_v39  ;;  %1879 = vmatpush.bf16.msra.mxu0 %v2783_v41  ;;  %v2550_v39 = vor.u32 %v2760_v29, %v2549_v28  ;;  %v431_v41 = vshrl.u32 %v3151_v3, 16  ;;  %v2481_v28 = vld [vmem:[%s2929_s22 + $0x8] sm:$0xc]  ;;  %v2747_v29 = vld [vmem:[%s2929_s22 + $0x8] sm:$0xf0] }
  0x55   : > { %1467 = vmatpush.bf16.msra.mxu2 %v2757_v38  ;;  %v2761_v38 = vld [vmem:[%s2929_s22 + $0x10] sm:$0xff]  ;;  %v630_v18 = vrot.slane %v619_v11, 1  ;;  %v1578_v11 = vunpack.c.l.b16 %v1539_v5 }
  0x56   : > { %v1587_v42 = vshrl.u32 %v2550_v39, 16  ;;  %v1590_v47 = vshll.u32 %v2550_v39, 16  ;;  %v433_v51 = vor.u32 %v431_v41, %v429_v19  ;;  %v441_v19 = vor.u32 %v439_v12, %v437_v52 }
  0x57   : > { %v2414_v39 = vor.u32 %v2734_v31, %v2413_v30 }
  0x58   : > { %1284 = vmatpush.bf16.msra.mxu1 %v2743_v49  ;;  %1880 = vmatpush.bf16.msra.mxu0 %v2782_v50  ;;  %v1598_v49 = vshll.u32 %v2761_v38, 16  ;;  %v628_v50 = vrot.slane %v2699_v40, 1  ;;  %v1589_v56 = vrot.slane %v1587_v42, 2  ;;  %v438_v61 = vsel %vm402_vm1, %v433_v51, %v437_v52  ;;  %v2774_v40 = vld [vmem:[%s2929_s22 + $0x10] sm:$0xff] }
  0x59   : > { %1468 = vmatpush.bf16.msra.mxu2 %v2756_v48  ;;  %v1595_v48 = vshrl.u32 %v2761_v38, 16  ;;  %v2735_v38 = vld [vmem:[%s2929_s22 + $0xc] sm:$0xff]  ;;  %v1217_v42 = vrot.slane %v2414_v39, 2  ;;  %v2738_v39 = vld [vmem:[%s2929_s22 + $0x24] sm:$0xff] }
  0x5b   : > { %513 = vmatmul.bf16.gmra.mxu1 %v422_v59  ;;  %1109 = vmatmul.bf16.gmra.mxu0 %v1015_v60  ;;  %v1600_v59 = vrot.slane %v1598_v49, 3  ;;  %v629_v60 = vsel %vm620_vm0, %v626_v17, %v628_v50  ;;  %v1607_v17 = vshll.u32 %v2762_v10, 16  ;;  %v1814_v49 = vrot.slane %v2774_v40, 3  ;;  %v2777_v40 = vld [vmem:[%s2929_s22 + $0x28] sm:$0xff] }
  0x5c   : > { %1285 = vmatpush.bf16.msra.mxu1 %v2742_v57  ;;  %1881 = vmatpush.bf16.msra.mxu0 %v2781_v0  ;;  %v1592_v57 = vrot.slane %v1590_v47, 3  ;;  %v2778_v0 = vld [vmem:[%s3350_s1 + $0x200] sm:$0xff]  ;;  %v1218_v47 = vrot.slane %v2735_v38, 2 }
  0x5d   : > { %1469 = vmatpush.bf16.msra.mxu2 %v2755_v55  ;;  %v356_v55 = vld [vmem:[%s2929_s22 + $0x28] sm:$0x1]  ;;  %v1609_v23 = vrot.slane %v1607_v17, 3  ;;  %v2737_v17 = vld [vmem:[%s2929_s22 + $0x1c] sm:$0xff] }
  0x5e   : > { %698 = vmatmul.bf16.gmra.mxu2 %v625_v58  ;;  %892 = vmatmul.bf16.gmra.mxu3 %v813_v6  ;;  %v1597_v58 = vrot.slane %v1595_v48, 2  ;;  %v1593_v3 = vor.u32 %v1592_v57, %v1589_v56  ;;  %v2764_v57 = vld [vmem:[%s2929_s22 + $0x28] sm:$0xff] }
  0x5f   : > { %v1625_v62 = vshll.u32 %v2764_v57, 16 }
  0x60   : > { %1286 = vmatpush.bf16.msra.mxu1 %v2741_v2  ;;  %1882 = vmatpush.bf16.msra.mxu0 %v2780_v8  ;;  %v988_v2 = vpack.c.b16 %v982_v54, %v982_v54  ;;  %v1601_v4 = vor.u32 %v1600_v59, %v1597_v58  ;;  %v2749_v58 = vld [vmem:[%s2929_s22 + $0x18] sm:$0xff] }
  0x61   : > { %1470 = vmatpush.bf16.msra.mxu2 %v2754_v63  ;;  %v395_v63 = vunpack.c.l.b16 %v356_v55  ;;  %v2736_v59 = vld [vmem:[%s2929_s22 + $0x14] sm:$0xff] }
  0x62   : > { %v1038_v8 = vshll.u32 %v988_v2, 16  ;;  %v1602_v9 = vsel %vm1585_vm3, %v1593_v3, %v1601_v4  ;;  %v1627_v3 = vrot.slane %v1625_v62, 3 }
  0x63   : > { %v401_v6 = vpack.c.b16 %v395_v63, %v395_v63  ;;  %v1404_v63 = vrot.slane %v2749_v58, 2 }
  0x64   : > { %1287 = vmatpush.bf16.msra.mxu1 %v2740_v27  ;;  %1883 = vmatpush.bf16.msra.mxu0 %v2779_v34  ;;  %v1040_v15 = vrot.slane %v1038_v8, 2  ;;  %v2617_v34 = vld [vmem:[%s2929_s22 + $0x8] sm:$0x8] }
  0x65   : > { %1471 = vmatpush.bf16.msra.mxu2 %v2753_v7  ;;  %v1035_v7 = vshrl.u32 %v988_v2, 16  ;;  %v443_v13 = vshll.u32 %v401_v6, 16  ;;  %v2618_v41 = vor.u32 %v2773_v35, %v2617_v34 }
  0x67   : > { %v1037_v14 = vrot.slane %v1035_v7, 1  ;;  %v445_v20 = vrot.slane %v443_v13, 1  ;;  %v1813_v48 = vrot.slane %v2618_v41, 3  ;;  %v1584_v13 = vpack.c.b16 %v1578_v11, %v1578_v11 }
  0x68   : > { %1288 = vmatpush.bf16.msra.mxu1 %v2739_v37  ;;  %1884 = vmatpush.bf16.msra.mxu0 %v2778_v0  ;;  %v2482_v37 = vor.u32 %v2747_v29, %v2481_v28  ;;  %v1220_v0 = vrot.slane %v2736_v59, 2 }
  0x69   : > { %1472 = vmatpush.bf16.msra.mxu2 %v2752_v33  ;;  %v1041_v21 = vor.u32 %v1040_v15, %v1037_v14  ;;  %v2763_v33 = vld [vmem:[%s2929_s22 + $0x20] sm:$0xff]  ;;  %v1815_v54 = vsel %vm1812_vm5, %v1813_v48, %v1814_v49 }
  0x6a   : > { %v1613_v43 = vshrl.u32 %v2763_v33, 16  ;;  %v1616_v44 = vshll.u32 %v2763_v33, 16  ;;  %v1401_v45 = vrot.slane %v2482_v37, 2  ;;  %v1221_v8 = vsel %vm1216_vm4, %v1218_v47, %v1220_v0  ;;  %v2750_v14 = vld [vmem:[%s2929_s22 + $0x20] sm:$0xff] }
  0x6b   : > { %518 = vmatmul.bf16.gmra.mxu1 %v430_v24  ;;  %1114 = vmatmul.bf16.gmra.mxu0 %v1024_v25  ;;  %v631_v24 = vsel %vm620_vm0, %v628_v50, %v630_v18  ;;  %v446_v25 = vsel %vm402_vm1, %v441_v19, %v445_v20  ;;  %v1042_v26 = vsel %vm989_vm2, %v1032_v53, %v1041_v21  ;;  %v2776_v18 = vld [vmem:[%s2929_s22 + $0x20] sm:$0xff]  ;;  %v1631_v19 = vshrl.u32 %v1584_v13, 16 }
  0x6c   : > { %v1615_v50 = vrot.slane %v1613_v43, 2  ;;  %v1618_v51 = vrot.slane %v1616_v44, 3  ;;  %v1219_v53 = vsel %vm1216_vm4, %v1217_v42, %v1218_v47  ;;  %v1634_v20 = vshll.u32 %v1584_v13, 16  ;;  %v1355_v47 = vld [vmem:[%s2929_s22 + $0x30] sm:$0x3] }
  0x6d   : > { %v1406_v21 = vrot.slane %v2750_v14, 2 }
  0x6e   : > { %703 = vmatmul.bf16.gmra.mxu2 %v627_v22  ;;  %897 = vmatmul.bf16.gmra.mxu3 %v815_v36  ;;  %v1606_v22 = vrot.slane %v1604_v16, 2  ;;  %v2748_v36 = vld [vmem:[%s2929_s22 + $0x10] sm:$0xff]  ;;  %v1619_v55 = vor.u32 %v1618_v51, %v1615_v50 }
  0x6f   : > { %v1402_v46 = vrot.slane %v2748_v36, 2  ;;  %v2751_v36 = vld [vmem:[%s2929_s22 + $0x28] sm:$0xff] }
  0x70   : > { %v1610_v27 = vor.u32 %v1609_v23, %v1606_v22  ;;  %v1222_v23 = vrot.slane %v2737_v17, 2  ;;  %v1408_v41 = vrot.slane %v2751_v36, 2 }
  0x71   : > { %v1403_v52 = vsel %vm1216_vm4, %v1401_v45, %v1402_v46  ;;  %v1224_v45 = vrot.slane %v2738_v39, 2 }
  0x72   : > { %v1611_v32 = vsel %vm1585_vm3, %v1601_v4, %v1610_v27  ;;  %v1620_v56 = vsel %vm1585_vm3, %v1610_v27, %v1619_v55  ;;  %v1405_v4 = vsel %vm1216_vm4, %v1402_v46, %v1404_v63  ;;  %v1407_v27 = vsel %vm1216_vm4, %v1404_v63, %v1406_v21 }
  0x73   : > { %v1223_v30 = vsel %vm1216_vm4, %v1220_v0, %v1222_v23  ;;  %v1820_v46 = vrot.slane %v2777_v40, 3  ;;  %v1409_v42 = vsel %vm1216_vm4, %v1406_v21, %v1408_v41  ;;  %v1225_v50 = vsel %vm1216_vm4, %v1222_v23, %v1224_v45 }
  0x7b   : > { %523 = vmatmul.bf16.gmra.mxu1 %v438_v61  ;;  %1119 = vmatmul.bf16.gmra.mxu0 %v1033_v1  ;;  %v1622_v61 = vshrl.u32 %v2764_v57, 16 }
  0x7d   : > { %v1624_v2 = vrot.slane %v1622_v61, 2 }
  0x7e   : > { %708 = vmatmul.bf16.gmra.mxu2 %v629_v60  ;;  %1700 = vmatmul.bf16.vlgmr.msrb.gmra.mxu3 %v1602_v9  ;;  %v2775_v60 = vld [vmem:[%s2929_s22 + $0x18] sm:$0xff] }
  0x7f   : > { %v1816_v1 = vrot.slane %v2775_v60, 3  ;;  %v1628_v10 = vor.u32 %v1627_v3, %v1624_v2 }
  0x81   : > { %v1817_v9 = vsel %vm1812_vm5, %v1814_v49, %v1816_v1  ;;  %v1629_v12 = vsel %vm1585_vm3, %v1619_v55, %v1628_v10  ;;  %v1394_v55 = vunpack.c.l.b16 %v1355_v47 }
  0x83   : > { %v1400_v61 = vpack.c.b16 %v1394_v55, %v1394_v55 }
  0x85   : > { %v1410_v5 = vrot.slane %v1400_v61, 2 }
  0x8b   : > { %528 = vmatmul.bf16.gmra.mxu1 %v446_v25  ;;  %1124 = vmatmul.bf16.gmra.mxu0 %v1042_v26  ;;  %v1633_v25 = vrot.slane %v1631_v19, 2  ;;  %v1636_v26 = vrot.slane %v1634_v20, 3 }
  0x8e   : > { %713 = vmatmul.bf16.gmra.mxu2 %v631_v24  ;;  %1705 = vmatmul.bf16.gmra.mxu3 %v1611_v32  ;;  %v1818_v24 = vrot.slane %v2776_v18, 3  ;;  %v1637_v32 = vor.u32 %v1636_v26, %v1633_v25 }
  0x90   : > { %v1819_v31 = vsel %vm1812_vm5, %v1816_v1, %v1818_v24  ;;  %v1638_v35 = vsel %vm1585_vm3, %v1628_v10, %v1637_v32  ;;  %v1821_v51 = vsel %vm1812_vm5, %v1818_v24, %v1820_v46 }
  0x9b   : > { %1289 = vmatmul.bf16.vlgmr.msra.gmra.mxu1 %v1219_v53  ;;  %1885 = vmatmul.bf16.vlgmr.msra.gmra.mxu0 %v1815_v54  ;;  %v1170_v53 = vld [vmem:[%s2929_s22 + $0x2c] sm:$0x3]  ;;  %v1766_v54 = vld [vmem:[%s2929_s22 + $0x30] sm:$0x7] }
  0x9c   : > { %v1209_v58 = vunpack.c.l.b16 %v1170_v53  ;;  %v1805_v59 = vunpack.c.l.b16 %v1766_v54 }
  0x9e   : > { %1473 = vmatmul.bf16.vlgmr.msra.gmra.mxu2 %v1403_v52  ;;  %1710 = vmatmul.bf16.gmra.mxu3 %v1620_v56  ;;  %v1215_v1 = vpack.c.b16 %v1209_v58, %v1209_v58  ;;  %v1811_v2 = vpack.c.b16 %v1805_v59, %v1805_v59 }
  0xa0   : > { %v1822_v10 = vrot.slane %v1811_v2, 3 }
  0xa2   : > { %v1823_v19 = vsel %vm1812_vm5, %v1820_v46, %v1822_v10 }
  0xa8   : > { %v311_v6 = vpop.f32.mrf.mxu0  ;;  %v3235_v7 = vpop.f32.mrf.mxu1 }
  0xab   : > { %1294 = vmatmul.bf16.gmra.mxu1 %v1221_v8  ;;  %1890 = vmatmul.bf16.gmra.mxu0 %v1817_v9  ;;  %v1226_v9 = vrot.slane %v1215_v1, 2 }
  0xad   : > { %v1227_v18 = vsel %vm1216_vm4, %v1224_v45, %v1226_v9 }
  0xae   : > { %1478 = vmatmul.bf16.gmra.mxu2 %v1405_v4  ;;  %1715 = vmatmul.bf16.gmra.mxu3 %v1629_v12  ;;  %v1411_v12 = vsel %vm1216_vm4, %v1408_v41, %v1410_v5 }
  0xb0   : > { %v313_v15 = vpop.f32.mrf.mxu0  ;;  %v3241_v16 = vpop.f32.mrf.mxu1 }
  0xb1   : > { %v878_v22 = vpop.f32.mrf.mxu3  ;;  %v3250_v33 = vpop.f32.mrf.mxu2 }
  0xb8   : > { %v316_v28 = vpop.f32.mrf.mxu0  ;;  %v3246_v29 = vpop.f32.mrf.mxu1 }
  0xb9   : > { %v880_v34 = vpop.f32.mrf.mxu3  ;;  %v3258_v44 = vpop.f32.mrf.mxu2 }
  0xbb   : > { %1299 = vmatmul.bf16.gmra.mxu1 %v1223_v30  ;;  %1895 = vmatmul.bf16.gmra.mxu0 %v1819_v31 }
  0xbe   : > { %1483 = vmatmul.bf16.gmra.mxu2 %v1407_v27  ;;  %1720 = vmatmul.bf16.gmra.mxu3 %v1638_v35 }
  0xc0   : > { %v318_v37 = vpop.f32.mrf.mxu0  ;;  %v3254_v38 = vpop.f32.mrf.mxu1 }
  0xc1   : > { %v883_v43 = vpop.f32.mrf.mxu3 }
  0xc8   : > { %v509_v48 = vpop.f32.mrf.mxu1  ;;  %v1105_v49 = vpop.f32.mrf.mxu0 }
  0xc9   : > { %v544_v52 = vadd.f32 %v509_v48, %v311_v6  ;;  %v885_v56 = vpop.f32.mrf.mxu3 }
  0xcb   : > { %1304 = vmatmul.bf16.gmra.mxu1 %v1225_v50  ;;  %1900 = vmatmul.bf16.gmra.mxu0 %v1821_v51 }
  0xce   : > { %1488 = vmatmul.bf16.gmra.mxu2 %v1409_v42 }
  0xd0   : > { %v511_v63 = vpop.f32.mrf.mxu1  ;;  %v1107_v0 = vpop.f32.mrf.mxu0 }
  0xd1   : > { %v694_v57 = vpop.f32.mrf.mxu2  ;;  %v545_v3 = vadd.f32 %v511_v63, %v313_v15  ;;  %v888_v6 = vpop.f32.mrf.mxu3 }
  0xd2   : > { %v729_v60 = vadd.f32 %v694_v57, %v544_v52 }
  0xd4   : > { %v913_v62 = vadd.f32 %v878_v22, %v729_v60 }
  0xd6   : > { %v3266_v4 = vadd.f32 %v1105_v49, %v913_v62 }
  0xd8   : > { %v514_v14 = vpop.f32.mrf.mxu1  ;;  %v1110_v17 = vpop.f32.mrf.mxu0 }
  0xd9   : > { %v696_v8 = vpop.f32.mrf.mxu2  ;;  %v546_v20 = vadd.f32 %v514_v14, %v316_v28  ;;  %v890_v21 = vpop.f32.mrf.mxu3 }
  0xda   : > { %v730_v11 = vadd.f32 %v696_v8, %v545_v3 }
  0xdb   : > { %1309 = vmatmul.bf16.gmra.mxu1 %v1227_v18  ;;  %1905 = vmatmul.bf16.gmra.mxu0 %v1823_v19 }
  0xdc   : > { %v914_v13 = vadd.f32 %v880_v34, %v730_v11 }
  0xde   : > { %1493 = vmatmul.bf16.gmra.mxu2 %v1411_v12  ;;  %v3271_v15 = vadd.f32 %v1107_v0, %v914_v13 }
  0xe0   : > { %v516_v25 = vpop.f32.mrf.mxu1  ;;  %v1112_v26 = vpop.f32.mrf.mxu0 }
  0xe1   : > { %v699_v22 = vpop.f32.mrf.mxu2  ;;  %v547_v27 = vadd.f32 %v516_v25, %v318_v37  ;;  %v893_v31 = vpop.f32.mrf.mxu3 }
  0xe2   : > { %v731_v23 = vadd.f32 %v699_v22, %v546_v20 }
  0xe4   : > { %v915_v24 = vadd.f32 %v883_v43, %v731_v23 }
  0xe6   : > { %v3273_v30 = vadd.f32 %v1110_v17, %v915_v24 }
  0xe8   : > { %v519_v36 = vpop.f32.mrf.mxu1  ;;  %v1115_v28 = vpop.f32.mrf.mxu0 }
  0xe9   : > { %v701_v32 = vpop.f32.mrf.mxu2  ;;  %v548_v39 = vadd.f32 %v519_v36, %v3235_v7  ;;  %v895_v46 = vpop.f32.mrf.mxu3 }
  0xea   : > { %v732_v34 = vadd.f32 %v701_v32, %v547_v27 }
  0xec   : > { %v916_v35 = vadd.f32 %v885_v56, %v732_v34  ;;  %v3300_v34 = vld [vmem:[%s3351_s2] ss:$0 sm:$0xff] }
  0xee   : > { %v3276_v40 = vadd.f32 %v1112_v26, %v916_v35 }
  0xf0   : > { %v521_v43 = vpop.f32.mrf.mxu1  ;;  %v1117_v47 = vpop.f32.mrf.mxu0 }
  0xf1   : > { %v704_v41 = vpop.f32.mrf.mxu2  ;;  %v549_v37 = vadd.f32 %v521_v43, %v3241_v16  ;;  %v898_v52 = vpop.f32.mrf.mxu3 }
  0xf2   : > { %v733_v45 = vadd.f32 %v704_v41, %v548_v39 }
  0xf4   : > { %v917_v42 = vadd.f32 %v888_v6, %v733_v45 }
  0xf6   : > { %v3279_v48 = vadd.f32 %v1115_v28, %v917_v42  ;;  %v3306_v28 = vld [vmem:[%s3352_s3] ss:$0 sm:$0xff] }
  0xf8   : > { %v524_v53 = vpop.f32.mrf.mxu1  ;;  %v1120_v54 = vpop.f32.mrf.mxu0 }
  0xf9   : > { %v706_v49 = vpop.f32.mrf.mxu2  ;;  %v550_v7 = vadd.f32 %v524_v53, %v3246_v29  ;;  %v900_v16 = vpop.f32.mrf.mxu3 }
  0xfa   : > { %v734_v50 = vadd.f32 %v706_v49, %v549_v37 }
  0xfc   : > { %v918_v51 = vadd.f32 %v890_v21, %v734_v50 }
  0xfe   : > { %v3282_v55 = vadd.f32 %v1117_v47, %v918_v51 }
 0x100   : > { %v526_v59 = vpop.f32.mrf.mxu1  ;;  %v1122_v60 = vpop.f32.mrf.mxu0 }
 0x101   : > { %v709_v56 = vpop.f32.mrf.mxu2  ;;  %v551_v61 = vadd.f32 %v526_v59, %v3254_v38  ;;  %v1701_v6 = vpop.f32.mrf.mxu3 }
 0x102   : > { %v735_v57 = vadd.f32 %v709_v56, %v550_v7 }
 0x104   : > { %v919_v58 = vadd.f32 %v893_v31, %v735_v57 }
 0x106   : > { %v3285_v62 = vadd.f32 %v1120_v54, %v919_v58 }
 0x108   : > { %v529_v2 = vpop.f32.mrf.mxu1  ;;  %v1125_v3 = vpop.f32.mrf.mxu0 }
 0x109   : > { %v711_v63 = vpop.f32.mrf.mxu2  ;;  %v552_v5 = vadd.f32 %v529_v2, %v3250_v33  ;;  %v1703_v18 = vpop.f32.mrf.mxu3 }
 0x10a   : > { %v736_v0 = vadd.f32 %v711_v63, %v551_v61 }
 0x10c   : > { %v920_v1 = vadd.f32 %v895_v46, %v736_v0 }
 0x10e   : > { %v3288_v29 = vadd.f32 %v1122_v60, %v920_v1 }
 0x110   : > { %v531_v11 = vpop.f32.mrf.mxu1  ;;  %v1127_v12 = vpop.f32.mrf.mxu0 }
 0x111   : > { %v714_v8 = vpop.f32.mrf.mxu2  ;;  %v553_v38 = vadd.f32 %v531_v11, %v3258_v44  ;;  %v1706_v26 = vpop.f32.mrf.mxu3 }
 0x112   : > { %v737_v9 = vadd.f32 %v714_v8, %v552_v5 }
 0x114   : > { %v921_v10 = vadd.f32 %v898_v52, %v737_v9 }
 0x116   : > { %v3291_v13 = vadd.f32 %v1125_v3, %v921_v10 }
 0x118   : > { %v1290_v20 = vpop.f32.mrf.mxu1  ;;  %v1886_v21 = vpop.f32.mrf.mxu0 }
 0x119   : > { %v716_v14 = vpop.f32.mrf.mxu2  ;;  %v1325_v33 = vadd.f32 %v1290_v20, %v3266_v4  ;;  %v1708_v42 = vpop.f32.mrf.mxu3 }
 0x11a   : > { %v738_v17 = vadd.f32 %v716_v14, %v553_v38 }
 0x11c   : > { %v922_v19 = vadd.f32 %v900_v16, %v738_v17 }
 0x11e   : > { %v3294_v22 = vadd.f32 %v1127_v12, %v922_v19 }
 0x120   : > { %v1292_v27 = vpop.f32.mrf.mxu1  ;;  %v1888_v31 = vpop.f32.mrf.mxu0 }
 0x121   : > { %v1474_v23 = vpop.f32.mrf.mxu2  ;;  %v1326_v44 = vadd.f32 %v1292_v27, %v3271_v15  ;;  %v1711_v59 = vpop.f32.mrf.mxu3 }
 0x122   : > { %v1509_v24 = vadd.f32 %v1474_v23, %v1325_v33 }
 0x124   : > { %v1736_v25 = vadd.f32 %v1701_v6, %v1509_v24 }
 0x126   : > { %v1921_v32 = vadd.f32 %v1886_v21, %v1736_v25 }
 0x128   : > { %v1955_v4 = vmul.f32 %v3300_v34, %v1921_v32  ;;  %v1295_v41 = vpop.f32.mrf.mxu1  ;;  %v1891_v45 = vpop.f32.mrf.mxu0 }
 0x129   : > { %v1476_v35 = vpop.f32.mrf.mxu2  ;;  %v1327_v15 = vadd.f32 %v1295_v41, %v3273_v30  ;;  %v1713_v9 = vpop.f32.mrf.mxu3 }
 0x12a   : > { %v1510_v36 = vadd.f32 %v1476_v35, %v1326_v44  ;;  %v1969_v43 = vadd.f32 %v3306_v28, %v1955_v4 }
 0x12c   : > { %v1737_v39 = vadd.f32 %v1703_v18, %v1510_v36  ;;  %v1979_v51 = vmax.f32 %v1969_v43, 0.0 }
 0x12e   : > { %v1922_v46 = vadd.f32 %v1888_v31, %v1737_v39 }
 0x130   : > { %v1956_v47 = vmul.f32 %v3300_v34, %v1922_v46  ;;  %v1297_v30 = vpop.f32.mrf.mxu1  ;;  %v1893_v54 = vpop.f32.mrf.mxu0 }
 0x131   : > { %v1479_v37 = vpop.f32.mrf.mxu2  ;;  %v1328_v56 = vadd.f32 %v1297_v30, %v3276_v40  ;;  %v1716_v23 = vpop.f32.mrf.mxu3 }
 0x132   : > { %v1970_v49 = vadd.f32 %v3306_v28, %v1956_v47  ;;  %v1511_v50 = vadd.f32 %v1479_v37, %v1327_v15 }
 0x134   : > { %v1980_v52 = vmax.f32 %v1970_v49, 0.0  ;;  %v1738_v53 = vadd.f32 %v1706_v26, %v1511_v50 }
 0x136   : > { %v2789_v7 = vpack.c.bf16 %v1980_v52, %v1979_v51  ;;  %v1923_v57 = vadd.f32 %v1891_v45, %v1738_v53 }
 0x138   : > { %2790 = vst [vmem:[%s3316_s6] sm:$0xff] %v2789_v7   ;;  %v1957_v61 = vmul.f32 %v3300_v34, %v1923_v57  ;;  %v1300_v63 = vpop.f32.mrf.mxu1  ;;  %v1896_v0 = vpop.f32.mrf.mxu0 }
 0x139   : > { %v1481_v58 = vpop.f32.mrf.mxu2  ;;  %v1329_v2 = vadd.f32 %v1300_v63, %v3279_v48  ;;  %v1718_v15 = vpop.f32.mrf.mxu3 }
 0x13a   : > { %v1512_v60 = vadd.f32 %v1481_v58, %v1328_v56  ;;  %v1971_v3 = vadd.f32 %v3306_v28, %v1957_v61 }
 0x13c   : > { %v1739_v16 = vadd.f32 %v1708_v42, %v1512_v60  ;;  %v1981_v10 = vmax.f32 %v1971_v3, 0.0 }
 0x13e   : > { %v1924_v1 = vadd.f32 %v1893_v54, %v1739_v16 }
 0x140   : > { %v1958_v5 = vmul.f32 %v3300_v34, %v1924_v1  ;;  %v1302_v38 = vpop.f32.mrf.mxu1  ;;  %v1898_v14 = vpop.f32.mrf.mxu0 }
 0x141   : > { %v1484_v6 = vpop.f32.mrf.mxu2  ;;  %v1330_v18 = vadd.f32 %v1302_v38, %v3282_v55  ;;  %v1721_v54 = vpop.f32.mrf.mxu3 }
 0x142   : > { %v1972_v40 = vadd.f32 %v3306_v28, %v1958_v5  ;;  %v1513_v8 = vadd.f32 %v1484_v6, %v1329_v2 }
 0x144   : > { %v1982_v11 = vmax.f32 %v1972_v40, 0.0  ;;  %v1740_v12 = vadd.f32 %v1711_v59, %v1513_v8 }
 0x146   : > { %v2794_v17 = vpack.c.bf16 %v1982_v11, %v1981_v10  ;;  %v1925_v19 = vadd.f32 %v1896_v0, %v1740_v12 }
 0x148   : > { %2811 = vst [vmem:[%s3316_s6 + $0x8] sm:$0xff] %v2794_v17   ;;  %v1959_v21 = vmul.f32 %v3300_v34, %v1925_v19  ;;  %v1305_v24 = vpop.f32.mrf.mxu1  ;;  %v1901_v27 = vpop.f32.mrf.mxu0 }
 0x149   : > { %v1486_v48 = vpop.f32.mrf.mxu2  ;;  %v1331_v26 = vadd.f32 %v1305_v24, %v3285_v62  ;;  %v1723_v5 = vpop.f32.mrf.mxu3 }
 0x14a   : > { %v1514_v20 = vadd.f32 %v1486_v48, %v1330_v18  ;;  %v1973_v31 = vadd.f32 %v3306_v28, %v1959_v21 }
 0x14c   : > { %v1741_v33 = vadd.f32 %v1713_v9, %v1514_v20  ;;  %v1983_v36 = vmax.f32 %v1973_v31, 0.0 }
 0x14e   : > { %v1926_v25 = vadd.f32 %v1898_v14, %v1741_v33 }
 0x150   : > { %v1960_v44 = vmul.f32 %v3300_v34, %v1926_v25  ;;  %v1307_v41 = vpop.f32.mrf.mxu1  ;;  %v1903_v62 = vpop.f32.mrf.mxu0 }
 0x151   : > { %v1489_v32 = vpop.f32.mrf.mxu2  ;;  %v1332_v46 = vadd.f32 %v1307_v41, %v3288_v29 }
 0x152   : > { %v1974_v55 = vadd.f32 %v3306_v28, %v1960_v44  ;;  %v1515_v35 = vadd.f32 %v1489_v32, %v1331_v26 }
 0x154   : > { %v1984_v4 = vmax.f32 %v1974_v55, 0.0  ;;  %v1742_v39 = vadd.f32 %v1716_v23, %v1515_v35 }
 0x156   : > { %v2799_v45 = vpack.c.bf16 %v1984_v4, %v1983_v36  ;;  %v1927_v42 = vadd.f32 %v1901_v27, %v1742_v39 }
 0x158   : > { %2812 = vst [vmem:[%s3316_s6 + $0x10] sm:$0xff] %v2799_v45   ;;  %v1961_v37 = vmul.f32 %v3300_v34, %v1927_v42  ;;  %v1310_v50 = vpop.f32.mrf.mxu1  ;;  %v1906_v57 = vpop.f32.mrf.mxu0 }
 0x159   : > { %v1491_v43 = vpop.f32.mrf.mxu2  ;;  %v1333_v52 = vadd.f32 %v1310_v50, %v3291_v13 }
 0x15a   : > { %v1516_v47 = vadd.f32 %v1491_v43, %v1332_v46  ;;  %v1975_v53 = vadd.f32 %v3306_v28, %v1961_v37 }
 0x15c   : > { %v1743_v49 = vadd.f32 %v1718_v15, %v1516_v47  ;;  %v1985_v58 = vmax.f32 %v1975_v53, 0.0 }
 0x15e   : > { %v1928_v51 = vadd.f32 %v1903_v62, %v1743_v49 }
 0x160   : > { %v1962_v30 = vmul.f32 %v3300_v34, %v1928_v51  ;;  %v1312_v61 = vpop.f32.mrf.mxu1  ;;  %v1908_v40 = vpop.f32.mrf.mxu0 }
 0x161   : > { %v1494_v29 = vpop.f32.mrf.mxu2  ;;  %v1334_v0 = vadd.f32 %v1312_v61, %v3294_v22 }
 0x162   : > { %v1976_v7 = vadd.f32 %v3306_v28, %v1962_v30  ;;  %v1517_v56 = vadd.f32 %v1494_v29, %v1333_v52 }
 0x164   : > { %v1986_v59 = vmax.f32 %v1976_v7, 0.0  ;;  %v1744_v60 = vadd.f32 %v1721_v54, %v1517_v56 }
 0x166   : > { %v2804_v16 = vpack.c.bf16 %v1986_v59, %v1985_v58  ;;  %v1929_v63 = vadd.f32 %v1906_v57, %v1744_v60 }
 0x168   : > { %2813 = vst [vmem:[%s3316_s6 + $0x18] sm:$0xff] %v2804_v16   ;;  %v1963_v13 = vmul.f32 %v3300_v34, %v1929_v63 }
 0x169   : > { %v1496_v1 = vpop.f32.mrf.mxu2 }
 0x16a   : > { %v1977_v2 = vadd.f32 %v3306_v28, %v1963_v13  ;;  %v1518_v3 = vadd.f32 %v1496_v1, %v1334_v0 }
 0x16c   : > { %v1745_v6 = vadd.f32 %v1723_v5, %v1518_v3  ;;  %v1987_v11 = vmax.f32 %v1977_v2, 0.0 }
 0x16e   : > { %v1930_v8 = vadd.f32 %v1908_v40, %v1745_v6 }
 0x170   : > { %v1964_v9 = vmul.f32 %v3300_v34, %v1930_v8 }
 0x172   : > { %v1978_v10 = vadd.f32 %v3306_v28, %v1964_v9 }
 0x174   : > { %v1988_v12 = vmax.f32 %v1978_v10, 0.0 }
 0x176   : > { %v2809_v38 = vpack.c.bf16 %v1988_v12, %v1987_v11 }
 0x178   : > { %2814 = vst [vmem:[%s3316_s6 + $0x20] sm:$0xff] %v2809_v38  }
 0x179 PF: > { %s14_s15 = sadd.s32 1, %s2849_s15  }
 0x17a   : > { %p11_p4 = scmp.ge.s32.totalorder %s14_s15, 4  }
 0x17c   :  { %13 = sbr.rel (!%p11_p4) target bundleno = 1 (0x1), region = 74 }

</bundles_post_ra>
